<compile_context>
chip_gen: v7x
topology: tpu7x:2x2x1
jax: 0.10.0
libtpu: 0.0.40
codegen_flags: <defaults>
</compile_context>

<pallas_src>
import jax
import jax.numpy as jnp
from jax.experimental import pallas as pl
from jax.experimental.pallas import tpu as pltpu

# ---------------- config (small synthetic "mpnet") ----------------
VOCAB = 100
MAX_SEQ = 64
HIDDEN = 32
N_HEADS = 2
HEAD_DIM = HIDDEN // N_HEADS
FFN = 64
N_LAYERS = 2
LN_EPS = 1e-12

PARAM_ORDER = ("wqkv", "bqkv", "wo", "w1", "b1", "w2", "vecs")


# ---------------- shared math helpers ----------------
def _layernorm(x, gamma, beta):
    mu = jnp.mean(x, axis=-1, keepdims=True)
    var = jnp.mean((x - mu) ** 2, axis=-1, keepdims=True)
    return (x - mu) * jax.lax.rsqrt(var + LN_EPS) * gamma + beta


def _fast_recip(x):
    # EUP approximate reciprocal + one Newton step on a tiny (...,1) tensor:
    # near-f32 accuracy, keeps the divide off the VALU.
    r = pl.reciprocal(x, approx=True)
    return r * (2.0 - x * r)


# ---------------- fused Pallas kernel: encoder stack + mean pooling ----------------
def encoder_pool_kernel(emb_ref, bias_ref, pmask_ref,
                        wqkv_ref, bqkv_ref, wo_ref, w1_ref, b1_ref, w2_ref, vecs_ref,
                        out_ref):
    Bt, S, H = emb_ref.shape          # Bt sequences handled by this grid step
    f32, b16 = jnp.float32, jnp.bfloat16

    # Residual stream stays f32; all GEMMs run on the flat (Bt*S, H) slab.
    x = emb_ref[...].astype(f32).reshape(Bt * S, H)

    # Attention bias (0 attend / -1e9 masked), broadcast ONCE (not per layer/head):
    bias = jnp.broadcast_to(bias_ref[...], (Bt, S, S))          # (Bt,S,S)

    for l in range(N_LAYERS):                                   # static unroll over layers
        vl = vecs_ref[l]                                        # (6,H): bo, g1, b1, b2, g2, b2

        # Fused QKV: one MXU pass instead of three; weights already bf16 at rest.
        qkv = jnp.dot(x.astype(b16), wqkv_ref[l],
                      preferred_element_type=f32) + bqkv_ref[l]  # (Bt*S, 3H), f32
        qkv = qkv.reshape(Bt, S, 3 * H).astype(b16)              # layout-free when S % 8 == 0

        attn = jnp.zeros((Bt * S, H), f32)
        for h in range(N_HEADS):                                 # static unroll; batched over Bt
            q = qkv[:, :, h * HEAD_DIM:(h + 1) * HEAD_DIM]                    # (Bt,S,D)
            k = qkv[:, :, H + h * HEAD_DIM:H + (h + 1) * HEAD_DIM]
            v = qkv[:, :, 2 * H + h * HEAD_DIM:2 * H + (h + 1) * HEAD_DIM]
            s = jnp.einsum('bqd,bkd->bqk', q, k,
                           preferred_element_type=f32) + bias                 # (Bt,S,S)
            s = s - jnp.max(s, axis=-1, keepdims=True)
            p = jnp.exp(s)
            # Safe: every attention row has >=1 unmasked token, so the denominator
            # is in [1, S]; an all-masked row would degrade to uniform attention.
            p = p * _fast_recip(jnp.sum(p, axis=-1, keepdims=True))
            ctx = jnp.einsum('bqk,bkd->bqd', p.astype(b16), v,
                             preferred_element_type=f32)                      # (Bt,S,D)
            # wo stored head-major (L,N,D,H): leading-dim ref index, no lane slice
            # of the weight; accumulate the per-head output projection in f32.
            attn = attn + jnp.dot(ctx.reshape(Bt * S, HEAD_DIM).astype(b16),
                                  wo_ref[l, h], preferred_element_type=f32)
        x = _layernorm(x + attn + vl[0:1], vl[1:2], vl[2:3])

        h1 = jax.nn.gelu(jnp.dot(x.astype(b16), w1_ref[l],
                                 preferred_element_type=f32) + b1_ref[l],
                         approximate=True)
        x = _layernorm(x + jnp.dot(h1.astype(b16), w2_ref[l],
                                   preferred_element_type=f32) + vl[3:4],
                       vl[4:5], vl[5:6])

    # Fused masked mean pooling on the MXU: per sequence b, its P pooling masks
    # reduce the encoded tokens with a (P,S)x(S,H) matmul (bf16 operands, f32 acc).
    # No (B,S,H) HBM writeback and no second kernel launch.
    x3 = x.reshape(Bt, S, H).astype(b16)
    pmask = pmask_ref[...]                                       # (Bt,P,S) bf16 {0,1}
    num = jnp.einsum('bps,bsh->bph', pmask, x3, preferred_element_type=f32)
    den = jnp.maximum(jnp.sum(pmask.astype(f32), axis=-1, keepdims=True), 1e-9)
    out_ref[...] = (num * _fast_recip(den)).astype(out_ref.dtype)


# ---------------- wrapper ----------------
def _num_tensorcores():
    # v7x has 2 TensorCores per chip sharing the 'parallel' grid axis.
    try:
        kind = jax.devices()[0].device_kind.lower()
        return 2 if ("v7" in kind or "7x" in kind) else 1
    except Exception:
        return 1


def _pick_block_b(B, S):
    """Pack ~256 GEMM rows per grid step (per-step overhead ~0.35us), but on
    v7x keep at least 2 steps whenever B >= 2 so both TensorCores get work.
    Must divide B."""
    bb = min(B, max(1, -(-256 // S)))
    nc = _num_tensorcores()
    if nc > 1 and B >= nc:
        bb = min(bb, B // nc)
    bb = max(bb, 1)
    while B % bb:
        bb -= 1
    return bb


def _full_spec(a):
    # whole (stacked-by-layer) weight resident every grid step
    return pl.BlockSpec(a.shape, lambda b, _n=a.ndim: (0,) * _n)


def encode_and_pool(emb, attn_mask, pool_masks, params):
    """emb: (B,S,H) f32; attn_mask: (B,S) {0,1}; pool_masks: (B,P,S) {0,1}.
    Returns (B,P,H): encoder output of sequence b mean-pooled with each of its
    P pooling masks (encoder + pooling fused in one pallas_call)."""
    B, S, H = emb.shape
    P = pool_masks.shape[1]
    Bt = _pick_block_b(B, S)

    # Precompute the additive attention bias in the wrapper (hoisted (m-1)*1e9).
    attn_bias = (attn_mask.astype(jnp.float32).reshape(B, 1, S) - 1.0) * 1e9
    pmask = pool_masks.astype(jnp.bfloat16)         # {0,1} exact in bf16, half the DMA

    weights = [params[k] for k in PARAM_ORDER]

    # Explicit scoped-VMEM budget sized from the actual buffers (+margin),
    # so growing Bt never trips the 16/32 MiB default scoped limit first.
    blk_bytes = Bt * S * H * 4 + Bt * S * 4 + Bt * P * S * 2 + Bt * P * H * 4
    w_bytes = sum(int(w.size) * w.dtype.itemsize for w in weights)
    vmem_limit = int(min(max(4 * (blk_bytes + w_bytes) + (8 << 20), 16 << 20), 64 << 20))

    in_specs = ([pl.BlockSpec((Bt, S, H), lambda b: (b, 0, 0)),
                 pl.BlockSpec((Bt, 1, S), lambda b: (b, 0, 0)),
                 pl.BlockSpec((Bt, P, S), lambda b: (b, 0, 0))]
                + [_full_spec(w) for w in weights])

    return pl.pallas_call(
        encoder_pool_kernel,
        out_shape=jax.ShapeDtypeStruct((B, P, H), jnp.float32),
        grid=(B // Bt,),
        in_specs=in_specs,
        out_specs=pl.BlockSpec((Bt, P, H), lambda b: (b, 0, 0)),
        compiler_params=pltpu.CompilerParams(
            dimension_semantics=("parallel",),
            vmem_limit_bytes=vmem_limit),
    )(emb, attn_bias, pmask, *weights)


class SBertPallas:
    """Synthetic SBert: deterministic small encoder + fused Pallas encode+pool."""

    def __init__(self, key):
        ks = jax.random.split(key, 8)
        f32 = jnp.float32
        init = lambda k, shape: (0.02 * jax.random.normal(k, shape)).astype(f32)
        self.word_emb = init(ks[0], (VOCAB, HIDDEN))
        self.pos_emb = init(ks[1], (MAX_SEQ, HIDDEN))

        L, H, F, N, D = N_LAYERS, HIDDEN, FFN, N_HEADS, HEAD_DIM
        scale = f32(1.0 / (D ** 0.5))
        # 1/sqrt(head_dim) folded ONCE (host side) into the Q part of the fused
        # QKV weight/bias.  TODO(synk): re-apply this fold if real pretrained
        # weights are ever loaded.
        wq = init(ks[2], (L, H, H)) * scale
        wk = init(ks[3], (L, H, H))
        wv = init(ks[4], (L, H, H))
        bq = jnp.zeros((L, 1, H), f32) * scale
        bk = jnp.zeros((L, 1, H), f32)
        bv = jnp.zeros((L, 1, H), f32)

        self.params = {
            # matmul weights stored bf16 at rest; biases / LN params stay f32
            "wqkv": jnp.concatenate([wq, wk, wv], axis=-1).astype(jnp.bfloat16),   # (L,H,3H)
            "bqkv": jnp.concatenate([bq, bk, bv], axis=-1),                        # (L,1,3H)
            "wo": init(ks[5], (L, H, H)).reshape(L, N, D, H).astype(jnp.bfloat16), # head-major
            "w1": init(ks[6], (L, H, F)).astype(jnp.bfloat16),
            "b1": jnp.zeros((L, 1, F), f32),
            "w2": init(ks[7], (L, F, H)).astype(jnp.bfloat16),
            # stacked per-layer vectors: [bo, ln1_g, ln1_b, ffn_b2, ln2_g, ln2_b]
            "vecs": jnp.stack([jnp.zeros((L, H), f32), jnp.ones((L, H), f32),
                               jnp.zeros((L, H), f32), jnp.zeros((L, H), f32),
                               jnp.ones((L, H), f32), jnp.zeros((L, H), f32)],
                              axis=1),                                             # (L,6,H)
        }

    def _embed(self, input_ids):
        # Embedding-table gather + learned positions stay in XLA: a VMEM gather
        # kernel buys nothing at VOCAB=100 / H=32.
        S = input_ids.shape[-1]
        return jnp.take(self.word_emb, input_ids, axis=0) + self.pos_emb[:S][None]

    # mirrors SBert.forward
    def __call__(self, input_ids, masks):
        if input_ids.ndim == 2:
            return self.get_local_embeddings(input_ids, masks)
        elif input_ids.ndim == 1:
            return self.get_global_embeddings(input_ids[None, :], masks)

    def get_local_embeddings(self, input_ids, attention_mask):
        emb = self._embed(input_ids)
        pooled = encode_and_pool(emb, attention_mask,
                                 attention_mask[:, None, :], self.params)   # (B,1,H)
        return pooled[:, 0, :]

    def get_global_embeddings(self, input_ids, phrase_masks):
        # model run without attention mask (all-ones); each phrase mask pools the
        # same token embeddings (done in-kernel, no (P,S,H) broadcast materialized)
        emb = self._embed(input_ids)                                          # (1,S,H)
        ones = jnp.ones(input_ids.shape, jnp.float32)
        pooled = encode_and_pool(emb, ones, phrase_masks[None, :, :], self.params)  # (1,P,H)
        return pooled[0]


# ---------------- pure-JAX reference (matches kernel's bf16 MXU operand precision) ----------------
def _ref_encoder(emb, attention_mask, params):
    f32, b16 = jnp.float32, jnp.bfloat16
    x = emb.astype(f32)
    bias = (attention_mask.astype(f32)[:, None, :] - 1.0) * 1e9   # (B,1,S)
    for l in range(N_LAYERS):
        vl = params["vecs"][l]                                    # (6,H)
        bo, g1, be1, b2, g2, be2 = (vl[i] for i in range(6))
        qkv = jnp.einsum('bsh,hk->bsk', x.astype(b16), params["wqkv"][l],
                         preferred_element_type=f32) + params["bqkv"][l]
        qkv = qkv.astype(b16)
        heads = []
        for h in range(N_HEADS):
            q = qkv[..., h * HEAD_DIM:(h + 1) * HEAD_DIM]
            k = qkv[..., HIDDEN + h * HEAD_DIM:HIDDEN + (h + 1) * HEAD_DIM]
            v = qkv[..., 2 * HIDDEN + h * HEAD_DIM:2 * HIDDEN + (h + 1) * HEAD_DIM]
            s = jnp.einsum('bqd,bkd->bqk', q, k, preferred_element_type=f32) + bias
            p = jax.nn.softmax(s, axis=-1)
            ctx = jnp.einsum('bqk,bkd->bqd', p.astype(b16), v, preferred_element_type=f32)
            heads.append(jnp.einsum('bqd,dh->bqh', ctx.astype(b16), params["wo"][l, h],
                                    preferred_element_type=f32))
        attn = sum(heads) + bo
        x = _layernorm(x + attn, g1, be1)
        h1 = jax.nn.gelu(jnp.einsum('bsh,hf->bsf', x.astype(b16), params["w1"][l],
                                    preferred_element_type=f32) + params["b1"][l],
                         approximate=True)
        x = _layernorm(x + jnp.einsum('bsf,fh->bsh', h1.astype(b16), params["w2"][l],
                                      preferred_element_type=f32) + b2, g2, be2)
    return x


def _ref_mean_pool(token_embeddings, masks):
    # same precision as the kernel's pooling: bf16 MXU operands, f32 accumulate
    num = jnp.einsum('bs,bsh->bh', masks.astype(jnp.bfloat16),
                     token_embeddings.astype(jnp.bfloat16),
                     preferred_element_type=jnp.float32)
    den = jnp.maximum(jnp.sum(masks.astype(jnp.float32), axis=1, keepdims=True), 1e-9)
    return num / den


if __name__ == "__main__":
    model = SBertPallas(jax.random.PRNGKey(0))

    B, S, P = 2, 8, 3
    k1, k2, k3, k4 = jax.random.split(jax.random.PRNGKey(0), 4)
    input_ids = jax.random.randint(k1, (B, S), 0, VOCAB, dtype=jnp.int32)
    attn_mask = (jax.random.uniform(k2, (B, S)) > 0.3).astype(jnp.float32)
    attn_mask = attn_mask.at[:, 0].set(1.0)                     # keep at least one token

    # local (2-D input_ids) path
    local = jax.block_until_ready(model(input_ids, attn_mask))
    assert local.shape == (B, HIDDEN)

    # global (1-D input_ids) path with phrase masks
    ids_1d = jax.random.randint(k3, (S,), 0, VOCAB, dtype=jnp.int32)
    phrase_masks = (jax.random.uniform(k4, (P, S)) > 0.5).astype(jnp.float32)
    phrase_masks = phrase_masks.at[:, 0].set(1.0)
    global_emb = jax.block_until_ready(model(ids_1d, phrase_masks))
    assert global_emb.shape == (P, HIDDEN)

    # correctness check vs pure-JAX reference (same bf16 MXU operand precision;
    # tolerance also covers the EUP-reciprocal softmax/pool divisions)
    emb_l = model._embed(input_ids)
    ref_local = _ref_mean_pool(_ref_encoder(emb_l, attn_mask, model.params), attn_mask)
    emb_g = model._embed(ids_1d[None, :])
    tok_g = _ref_encoder(emb_g, jnp.ones((1, S), jnp.float32), model.params)
    ref_global = _ref_mean_pool(jnp.broadcast_to(tok_g, (P, S, HIDDEN)), phrase_masks)

    assert jnp.allclose(local, ref_local, atol=5e-3, rtol=5e-3), \
        float(jnp.max(jnp.abs(local - ref_local)))
    assert jnp.allclose(global_emb, ref_global, atol=5e-3, rtol=5e-3), \
        float(jnp.max(jnp.abs(global_emb - ref_global)))

    print("KERNEL_OK")
</pallas_src>

<mosaic_0001>
module attributes {stable_mosaic.version = 11 : i64} {
  func.func @encoder_pool_kernel(%arg0: i32, %arg1: memref<2x8x32xf32, #tpu.memory_space<vmem>>, %arg2: memref<2x1x8xf32, #tpu.memory_space<vmem>>, %arg3: memref<2x1x8xbf16, #tpu.memory_space<vmem>>, %arg4: memref<2x32x96xbf16, #tpu.memory_space<vmem>>, %arg5: memref<2x1x96xf32, #tpu.memory_space<vmem>>, %arg6: memref<2x2x16x32xbf16, #tpu.memory_space<vmem>>, %arg7: memref<2x32x64xbf16, #tpu.memory_space<vmem>>, %arg8: memref<2x1x64xf32, #tpu.memory_space<vmem>>, %arg9: memref<2x64x32xbf16, #tpu.memory_space<vmem>>, %arg10: memref<2x6x32xf32, #tpu.memory_space<vmem>>, %arg11: memref<2x1x32xf32, #tpu.memory_space<vmem>>) attributes {dimension_semantics = [#tpu.dimension_semantics<parallel>], iteration_bounds = array<i64: 1>, scalar_prefetch = 0 : i64, scratch_operands = 0 : i64, tpu.core_type = #tpu.core_type<tc>, window_params = [{transform_indices = @transform_0, window_bounds = array<i64: 2, 8, 32>}, {transform_indices = @transform_1, window_bounds = array<i64: 2, 1, 8>}, {transform_indices = @transform_2, window_bounds = array<i64: 2, 1, 8>}, {pipeline_mode = #tpu.pipeline_mode<synchronous>, transform_indices = @transform_3, window_bounds = array<i64: 2, 32, 96>}, {pipeline_mode = #tpu.pipeline_mode<synchronous>, transform_indices = @transform_4, window_bounds = array<i64: 2, 1, 96>}, {pipeline_mode = #tpu.pipeline_mode<synchronous>, transform_indices = @transform_5, window_bounds = array<i64: 2, 2, 16, 32>}, {pipeline_mode = #tpu.pipeline_mode<synchronous>, transform_indices = @transform_6, window_bounds = array<i64: 2, 32, 64>}, {pipeline_mode = #tpu.pipeline_mode<synchronous>, transform_indices = @transform_7, window_bounds = array<i64: 2, 1, 64>}, {pipeline_mode = #tpu.pipeline_mode<synchronous>, transform_indices = @transform_8, window_bounds = array<i64: 2, 64, 32>}, {pipeline_mode = #tpu.pipeline_mode<synchronous>, transform_indices = @transform_9, window_bounds = array<i64: 2, 6, 32>}, {transform_indices = @transform_10, window_bounds = array<i64: 2, 1, 32>}]} {
    %c0 = arith.constant 0 : index
    %c0_0 = arith.constant 0 : index
    %c0_1 = arith.constant 0 : index
    %0 = vector.load %arg1[%c0, %c0_0, %c0_1] : memref<2x8x32xf32, #tpu.memory_space<vmem>>, vector<2x8x32xf32>
    %1 = vector.shape_cast %0 : vector<2x8x32xf32> to vector<16x32xf32>
    %c0_2 = arith.constant 0 : index
    %c0_3 = arith.constant 0 : index
    %c0_4 = arith.constant 0 : index
    %2 = vector.load %arg2[%c0_2, %c0_3, %c0_4] : memref<2x1x8xf32, #tpu.memory_space<vmem>>, vector<2x1x8xf32>
    %3 = vector.shape_cast %2 : vector<2x1x8xf32> to vector<2x1x8xf32>
    %4 = vector.broadcast %3 : vector<2x1x8xf32> to vector<2x8x8xf32>
    %c0_5 = arith.constant 0 : index
    %c0_6 = arith.constant 0 : index
    %c0_7 = arith.constant 0 : index
    %5 = vector.load %arg10[%c0_5, %c0_6, %c0_7] : memref<2x6x32xf32, #tpu.memory_space<vmem>>, vector<1x6x32xf32>
    %6 = vector.shape_cast %5 : vector<1x6x32xf32> to vector<6x32xf32>
    %7 = arith.truncf %1 : vector<16x32xf32> to vector<16x32xbf16>
    %c0_8 = arith.constant 0 : index
    %c0_9 = arith.constant 0 : index
    %c0_10 = arith.constant 0 : index
    %8 = vector.load %arg4[%c0_8, %c0_9, %c0_10] : memref<2x32x96xbf16, #tpu.memory_space<vmem>>, vector<1x32x96xbf16>
    %9 = vector.shape_cast %8 : vector<1x32x96xbf16> to vector<32x96xbf16>
    %cst = arith.constant dense<0.000000e+00> : vector<16x96xf32>
    %10 = tpu.matmul %7, %9, %cst {dimension_numbers = #tpu.dot_dimension_numbers<[1], [0], [0], [1], [0, 0, 1, 1], [], []>} : vector<16x32xbf16>, vector<32x96xbf16>, vector<16x96xf32> -> vector<16x96xf32>
    %c0_11 = arith.constant 0 : index
    %c0_12 = arith.constant 0 : index
    %c0_13 = arith.constant 0 : index
    %11 = vector.load %arg5[%c0_11, %c0_12, %c0_13] : memref<2x1x96xf32, #tpu.memory_space<vmem>>, vector<1x1x96xf32>
    %12 = vector.shape_cast %11 : vector<1x1x96xf32> to vector<1x96xf32>
    %13 = vector.broadcast %12 : vector<1x96xf32> to vector<16x96xf32>
    %14 = arith.addf %10, %13 : vector<16x96xf32>
    %15 = vector.shape_cast %14 : vector<16x96xf32> to vector<2x8x96xf32>
    %16 = arith.truncf %15 : vector<2x8x96xf32> to vector<2x8x96xbf16>
    %cst_14 = arith.constant 0.000000e+00 : f32
    %17 = vector.broadcast %cst_14 : f32 to vector<16x32xf32>
    %18 = vector.extract_strided_slice %16 {offsets = [0, 0, 0], sizes = [2, 8, 16], strides = [1, 1, 1]} : vector<2x8x96xbf16> to vector<2x8x16xbf16>
    %19 = vector.extract_strided_slice %16 {offsets = [0, 0, 32], sizes = [2, 8, 16], strides = [1, 1, 1]} : vector<2x8x96xbf16> to vector<2x8x16xbf16>
    %20 = vector.extract_strided_slice %16 {offsets = [0, 0, 64], sizes = [2, 8, 16], strides = [1, 1, 1]} : vector<2x8x96xbf16> to vector<2x8x16xbf16>
    "tpu.trace_start"() <{level = 10 : i32, message = "bqd,bkd->bqk"}> : () -> ()
    %cst_15 = arith.constant dense<0.000000e+00> : vector<2x8x8xf32>
    %21 = tpu.matmul %18, %19, %cst_15 {dimension_numbers = #tpu.dot_dimension_numbers<[2], [2], [1], [1], [0, 0, 0, 1, 1, 1], [0], [0]>} : vector<2x8x16xbf16>, vector<2x8x16xbf16>, vector<2x8x8xf32> -> vector<2x8x8xf32>
    "tpu.trace_stop"() : () -> ()
    %22 = arith.addf %21, %4 : vector<2x8x8xf32>
    %cst_16 = arith.constant dense<0xFF800000> : vector<2x8xf32>
    %23 = vector.multi_reduction <maximumf>, %22, %cst_16 [2] : vector<2x8x8xf32> to vector<2x8xf32>
    %24 = vector.shape_cast %23 : vector<2x8xf32> to vector<2x8x1xf32>
    %25 = vector.broadcast %24 : vector<2x8x1xf32> to vector<2x8x8xf32>
    %26 = arith.subf %22, %25 : vector<2x8x8xf32>
    %27 = math.exp %26 : vector<2x8x8xf32>
    %cst_17 = arith.constant dense<0.000000e+00> : vector<2x8xf32>
    %28 = vector.multi_reduction <add>, %27, %cst_17 [2] : vector<2x8x8xf32> to vector<2x8xf32>
    %29 = vector.shape_cast %28 : vector<2x8xf32> to vector<2x8x1xf32>
    %30 = tpu.reciprocal %29 {approx = true} : vector<2x8x1xf32> -> vector<2x8x1xf32>
    %31 = arith.mulf %29, %30 : vector<2x8x1xf32>
    %cst_18 = arith.constant 2.000000e+00 : f32
    %32 = vector.broadcast %cst_18 : f32 to vector<2x8x1xf32>
    %33 = arith.subf %32, %31 : vector<2x8x1xf32>
    %34 = arith.mulf %30, %33 : vector<2x8x1xf32>
    %35 = vector.broadcast %34 : vector<2x8x1xf32> to vector<2x8x8xf32>
    %36 = arith.mulf %27, %35 : vector<2x8x8xf32>
    %37 = arith.truncf %36 : vector<2x8x8xf32> to vector<2x8x8xbf16>
    "tpu.trace_start"() <{level = 10 : i32, message = "bqk,bkd->bqd"}> : () -> ()
    %cst_19 = arith.constant dense<0.000000e+00> : vector<2x8x16xf32>
    %38 = tpu.matmul %37, %20, %cst_19 {dimension_numbers = #tpu.dot_dimension_numbers<[2], [1], [1], [2], [0, 0, 0, 1, 1, 2], [0], [0]>} : vector<2x8x8xbf16>, vector<2x8x16xbf16>, vector<2x8x16xf32> -> vector<2x8x16xf32>
    "tpu.trace_stop"() : () -> ()
    %39 = vector.shape_cast %38 : vector<2x8x16xf32> to vector<16x16xf32>
    %40 = arith.truncf %39 : vector<16x16xf32> to vector<16x16xbf16>
    %c0_20 = arith.constant 0 : index
    %c0_21 = arith.constant 0 : index
    %c0_22 = arith.constant 0 : index
    %c0_23 = arith.constant 0 : index
    %41 = vector.load %arg6[%c0_20, %c0_21, %c0_22, %c0_23] : memref<2x2x16x32xbf16, #tpu.memory_space<vmem>>, vector<1x1x16x32xbf16>
    %42 = vector.shape_cast %41 : vector<1x1x16x32xbf16> to vector<16x32xbf16>
    %cst_24 = arith.constant dense<0.000000e+00> : vector<16x32xf32>
    %43 = tpu.matmul %40, %42, %cst_24 {dimension_numbers = #tpu.dot_dimension_numbers<[1], [0], [0], [1], [0, 0, 1, 1], [], []>} : vector<16x16xbf16>, vector<16x32xbf16>, vector<16x32xf32> -> vector<16x32xf32>
    %44 = arith.addf %17, %43 : vector<16x32xf32>
    %45 = vector.extract_strided_slice %16 {offsets = [0, 0, 16], sizes = [2, 8, 16], strides = [1, 1, 1]} : vector<2x8x96xbf16> to vector<2x8x16xbf16>
    %46 = vector.extract_strided_slice %16 {offsets = [0, 0, 48], sizes = [2, 8, 16], strides = [1, 1, 1]} : vector<2x8x96xbf16> to vector<2x8x16xbf16>
    %47 = vector.extract_strided_slice %16 {offsets = [0, 0, 80], sizes = [2, 8, 16], strides = [1, 1, 1]} : vector<2x8x96xbf16> to vector<2x8x16xbf16>
    "tpu.trace_start"() <{level = 10 : i32, message = "bqd,bkd->bqk"}> : () -> ()
    %cst_25 = arith.constant dense<0.000000e+00> : vector<2x8x8xf32>
    %48 = tpu.matmul %45, %46, %cst_25 {dimension_numbers = #tpu.dot_dimension_numbers<[2], [2], [1], [1], [0, 0, 0, 1, 1, 1], [0], [0]>} : vector<2x8x16xbf16>, vector<2x8x16xbf16>, vector<2x8x8xf32> -> vector<2x8x8xf32>
    "tpu.trace_stop"() : () -> ()
    %49 = arith.addf %48, %4 : vector<2x8x8xf32>
    %cst_26 = arith.constant dense<0xFF800000> : vector<2x8xf32>
    %50 = vector.multi_reduction <maximumf>, %49, %cst_26 [2] : vector<2x8x8xf32> to vector<2x8xf32>
    %51 = vector.shape_cast %50 : vector<2x8xf32> to vector<2x8x1xf32>
    %52 = vector.broadcast %51 : vector<2x8x1xf32> to vector<2x8x8xf32>
    %53 = arith.subf %49, %52 : vector<2x8x8xf32>
    %54 = math.exp %53 : vector<2x8x8xf32>
    %cst_27 = arith.constant dense<0.000000e+00> : vector<2x8xf32>
    %55 = vector.multi_reduction <add>, %54, %cst_27 [2] : vector<2x8x8xf32> to vector<2x8xf32>
    %56 = vector.shape_cast %55 : vector<2x8xf32> to vector<2x8x1xf32>
    %57 = tpu.reciprocal %56 {approx = true} : vector<2x8x1xf32> -> vector<2x8x1xf32>
    %58 = arith.mulf %56, %57 : vector<2x8x1xf32>
    %cst_28 = arith.constant 2.000000e+00 : f32
    %59 = vector.broadcast %cst_28 : f32 to vector<2x8x1xf32>
    %60 = arith.subf %59, %58 : vector<2x8x1xf32>
    %61 = arith.mulf %57, %60 : vector<2x8x1xf32>
    %62 = vector.broadcast %61 : vector<2x8x1xf32> to vector<2x8x8xf32>
    %63 = arith.mulf %54, %62 : vector<2x8x8xf32>
    %64 = arith.truncf %63 : vector<2x8x8xf32> to vector<2x8x8xbf16>
    "tpu.trace_start"() <{level = 10 : i32, message = "bqk,bkd->bqd"}> : () -> ()
    %cst_29 = arith.constant dense<0.000000e+00> : vector<2x8x16xf32>
    %65 = tpu.matmul %64, %47, %cst_29 {dimension_numbers = #tpu.dot_dimension_numbers<[2], [1], [1], [2], [0, 0, 0, 1, 1, 2], [0], [0]>} : vector<2x8x8xbf16>, vector<2x8x16xbf16>, vector<2x8x16xf32> -> vector<2x8x16xf32>
    "tpu.trace_stop"() : () -> ()
    %66 = vector.shape_cast %65 : vector<2x8x16xf32> to vector<16x16xf32>
    %67 = arith.truncf %66 : vector<16x16xf32> to vector<16x16xbf16>
    %c0_30 = arith.constant 0 : index
    %c1 = arith.constant 1 : index
    %c0_31 = arith.constant 0 : index
    %c0_32 = arith.constant 0 : index
    %68 = vector.load %arg6[%c0_30, %c1, %c0_31, %c0_32] : memref<2x2x16x32xbf16, #tpu.memory_space<vmem>>, vector<1x1x16x32xbf16>
    %69 = vector.shape_cast %68 : vector<1x1x16x32xbf16> to vector<16x32xbf16>
    %cst_33 = arith.constant dense<0.000000e+00> : vector<16x32xf32>
    %70 = tpu.matmul %67, %69, %cst_33 {dimension_numbers = #tpu.dot_dimension_numbers<[1], [0], [0], [1], [0, 0, 1, 1], [], []>} : vector<16x16xbf16>, vector<16x32xbf16>, vector<16x32xf32> -> vector<16x32xf32>
    %71 = arith.addf %44, %70 : vector<16x32xf32>
    %72 = arith.addf %1, %71 : vector<16x32xf32>
    %73 = vector.extract_strided_slice %6 {offsets = [0, 0], sizes = [1, 32], strides = [1, 1]} : vector<6x32xf32> to vector<1x32xf32>
    %74 = vector.broadcast %73 : vector<1x32xf32> to vector<16x32xf32>
    %75 = arith.addf %72, %74 : vector<16x32xf32>
    %76 = vector.extract_strided_slice %6 {offsets = [1, 0], sizes = [1, 32], strides = [1, 1]} : vector<6x32xf32> to vector<1x32xf32>
    %77 = vector.extract_strided_slice %6 {offsets = [2, 0], sizes = [1, 32], strides = [1, 1]} : vector<6x32xf32> to vector<1x32xf32>
    %cst_34 = arith.constant dense<0.000000e+00> : vector<16xf32>
    %78 = vector.multi_reduction <add>, %75, %cst_34 [1] : vector<16x32xf32> to vector<16xf32>
    %79 = vector.shape_cast %78 : vector<16xf32> to vector<16x1xf32>
    %cst_35 = arith.constant 3.200000e+01 : f32
    %80 = vector.broadcast %cst_35 : f32 to vector<16x1xf32>
    %81 = arith.divf %79, %80 : vector<16x1xf32>
    %82 = vector.broadcast %81 : vector<16x1xf32> to vector<16x32xf32>
    %83 = arith.subf %75, %82 : vector<16x32xf32>
    %84 = arith.mulf %83, %83 : vector<16x32xf32>
    %cst_36 = arith.constant dense<0.000000e+00> : vector<16xf32>
    %85 = vector.multi_reduction <add>, %84, %cst_36 [1] : vector<16x32xf32> to vector<16xf32>
    %86 = vector.shape_cast %85 : vector<16xf32> to vector<16x1xf32>
    %cst_37 = arith.constant 3.200000e+01 : f32
    %87 = vector.broadcast %cst_37 : f32 to vector<16x1xf32>
    %88 = arith.divf %86, %87 : vector<16x1xf32>
    %89 = vector.broadcast %81 : vector<16x1xf32> to vector<16x32xf32>
    %90 = arith.subf %75, %89 : vector<16x32xf32>
    %cst_38 = arith.constant 9.99999996E-13 : f32
    %91 = vector.broadcast %cst_38 : f32 to vector<16x1xf32>
    %92 = arith.addf %88, %91 : vector<16x1xf32>
    %93 = math.rsqrt %92 : vector<16x1xf32>
    %94 = vector.broadcast %93 : vector<16x1xf32> to vector<16x32xf32>
    %95 = arith.mulf %90, %94 : vector<16x32xf32>
    %96 = vector.broadcast %76 : vector<1x32xf32> to vector<16x32xf32>
    %97 = arith.mulf %95, %96 : vector<16x32xf32>
    %98 = vector.broadcast %77 : vector<1x32xf32> to vector<16x32xf32>
    %99 = arith.addf %97, %98 : vector<16x32xf32>
    %100 = arith.truncf %99 : vector<16x32xf32> to vector<16x32xbf16>
    %c0_39 = arith.constant 0 : index
    %c0_40 = arith.constant 0 : index
    %c0_41 = arith.constant 0 : index
    %101 = vector.load %arg7[%c0_39, %c0_40, %c0_41] : memref<2x32x64xbf16, #tpu.memory_space<vmem>>, vector<1x32x64xbf16>
    %102 = vector.shape_cast %101 : vector<1x32x64xbf16> to vector<32x64xbf16>
    %cst_42 = arith.constant dense<0.000000e+00> : vector<16x64xf32>
    %103 = tpu.matmul %100, %102, %cst_42 {dimension_numbers = #tpu.dot_dimension_numbers<[1], [0], [0], [1], [0, 0, 1, 1], [], []>} : vector<16x32xbf16>, vector<32x64xbf16>, vector<16x64xf32> -> vector<16x64xf32>
    %c0_43 = arith.constant 0 : index
    %c0_44 = arith.constant 0 : index
    %c0_45 = arith.constant 0 : index
    %104 = vector.load %arg8[%c0_43, %c0_44, %c0_45] : memref<2x1x64xf32, #tpu.memory_space<vmem>>, vector<1x1x64xf32>
    %105 = vector.shape_cast %104 : vector<1x1x64xf32> to vector<1x64xf32>
    %106 = vector.broadcast %105 : vector<1x64xf32> to vector<16x64xf32>
    %107 = arith.addf %103, %106 : vector<16x64xf32>
    %108 = arith.mulf %107, %107 : vector<16x64xf32>
    %109 = arith.mulf %107, %108 : vector<16x64xf32>
    %cst_46 = arith.constant 4.471500e-02 : f32
    %110 = vector.broadcast %cst_46 : f32 to vector<16x64xf32>
    %111 = arith.mulf %110, %109 : vector<16x64xf32>
    %112 = arith.addf %107, %111 : vector<16x64xf32>
    %cst_47 = arith.constant 0.797884583 : f32
    %113 = vector.broadcast %cst_47 : f32 to vector<16x64xf32>
    %114 = arith.mulf %113, %112 : vector<16x64xf32>
    %115 = math.tanh %114 : vector<16x64xf32>
    %cst_48 = arith.constant 1.000000e+00 : f32
    %116 = vector.broadcast %cst_48 : f32 to vector<16x64xf32>
    %117 = arith.addf %116, %115 : vector<16x64xf32>
    %cst_49 = arith.constant 5.000000e-01 : f32
    %118 = vector.broadcast %cst_49 : f32 to vector<16x64xf32>
    %119 = arith.mulf %118, %117 : vector<16x64xf32>
    %120 = arith.mulf %107, %119 : vector<16x64xf32>
    %121 = arith.truncf %120 : vector<16x64xf32> to vector<16x64xbf16>
    %c0_50 = arith.constant 0 : index
    %c0_51 = arith.constant 0 : index
    %c0_52 = arith.constant 0 : index
    %122 = vector.load %arg9[%c0_50, %c0_51, %c0_52] : memref<2x64x32xbf16, #tpu.memory_space<vmem>>, vector<1x64x32xbf16>
    %123 = vector.shape_cast %122 : vector<1x64x32xbf16> to vector<64x32xbf16>
    %cst_53 = arith.constant dense<0.000000e+00> : vector<16x32xf32>
    %124 = tpu.matmul %121, %123, %cst_53 {dimension_numbers = #tpu.dot_dimension_numbers<[1], [0], [0], [1], [0, 0, 1, 1], [], []>} : vector<16x64xbf16>, vector<64x32xbf16>, vector<16x32xf32> -> vector<16x32xf32>
    %125 = arith.addf %99, %124 : vector<16x32xf32>
    %126 = vector.extract_strided_slice %6 {offsets = [3, 0], sizes = [1, 32], strides = [1, 1]} : vector<6x32xf32> to vector<1x32xf32>
    %127 = vector.broadcast %126 : vector<1x32xf32> to vector<16x32xf32>
    %128 = arith.addf %125, %127 : vector<16x32xf32>
    %129 = vector.extract_strided_slice %6 {offsets = [4, 0], sizes = [1, 32], strides = [1, 1]} : vector<6x32xf32> to vector<1x32xf32>
    %130 = vector.extract_strided_slice %6 {offsets = [5, 0], sizes = [1, 32], strides = [1, 1]} : vector<6x32xf32> to vector<1x32xf32>
    %cst_54 = arith.constant dense<0.000000e+00> : vector<16xf32>
    %131 = vector.multi_reduction <add>, %128, %cst_54 [1] : vector<16x32xf32> to vector<16xf32>
    %132 = vector.shape_cast %131 : vector<16xf32> to vector<16x1xf32>
    %cst_55 = arith.constant 3.200000e+01 : f32
    %133 = vector.broadcast %cst_55 : f32 to vector<16x1xf32>
    %134 = arith.divf %132, %133 : vector<16x1xf32>
    %135 = vector.broadcast %134 : vector<16x1xf32> to vector<16x32xf32>
    %136 = arith.subf %128, %135 : vector<16x32xf32>
    %137 = arith.mulf %136, %136 : vector<16x32xf32>
    %cst_56 = arith.constant dense<0.000000e+00> : vector<16xf32>
    %138 = vector.multi_reduction <add>, %137, %cst_56 [1] : vector<16x32xf32> to vector<16xf32>
    %139 = vector.shape_cast %138 : vector<16xf32> to vector<16x1xf32>
    %cst_57 = arith.constant 3.200000e+01 : f32
    %140 = vector.broadcast %cst_57 : f32 to vector<16x1xf32>
    %141 = arith.divf %139, %140 : vector<16x1xf32>
    %142 = vector.broadcast %134 : vector<16x1xf32> to vector<16x32xf32>
    %143 = arith.subf %128, %142 : vector<16x32xf32>
    %cst_58 = arith.constant 9.99999996E-13 : f32
    %144 = vector.broadcast %cst_58 : f32 to vector<16x1xf32>
    %145 = arith.addf %141, %144 : vector<16x1xf32>
    %146 = math.rsqrt %145 : vector<16x1xf32>
    %147 = vector.broadcast %146 : vector<16x1xf32> to vector<16x32xf32>
    %148 = arith.mulf %143, %147 : vector<16x32xf32>
    %149 = vector.broadcast %129 : vector<1x32xf32> to vector<16x32xf32>
    %150 = arith.mulf %148, %149 : vector<16x32xf32>
    %151 = vector.broadcast %130 : vector<1x32xf32> to vector<16x32xf32>
    %152 = arith.addf %150, %151 : vector<16x32xf32>
    %c1_59 = arith.constant 1 : index
    %c0_60 = arith.constant 0 : index
    %c0_61 = arith.constant 0 : index
    %153 = vector.load %arg10[%c1_59, %c0_60, %c0_61] : memref<2x6x32xf32, #tpu.memory_space<vmem>>, vector<1x6x32xf32>
    %154 = vector.shape_cast %153 : vector<1x6x32xf32> to vector<6x32xf32>
    %155 = arith.truncf %152 : vector<16x32xf32> to vector<16x32xbf16>
    %c1_62 = arith.constant 1 : index
    %c0_63 = arith.constant 0 : index
    %c0_64 = arith.constant 0 : index
    %156 = vector.load %arg4[%c1_62, %c0_63, %c0_64] : memref<2x32x96xbf16, #tpu.memory_space<vmem>>, vector<1x32x96xbf16>
    %157 = vector.shape_cast %156 : vector<1x32x96xbf16> to vector<32x96xbf16>
    %cst_65 = arith.constant dense<0.000000e+00> : vector<16x96xf32>
    %158 = tpu.matmul %155, %157, %cst_65 {dimension_numbers = #tpu.dot_dimension_numbers<[1], [0], [0], [1], [0, 0, 1, 1], [], []>} : vector<16x32xbf16>, vector<32x96xbf16>, vector<16x96xf32> -> vector<16x96xf32>
    %c1_66 = arith.constant 1 : index
    %c0_67 = arith.constant 0 : index
    %c0_68 = arith.constant 0 : index
    %159 = vector.load %arg5[%c1_66, %c0_67, %c0_68] : memref<2x1x96xf32, #tpu.memory_space<vmem>>, vector<1x1x96xf32>
    %160 = vector.shape_cast %159 : vector<1x1x96xf32> to vector<1x96xf32>
    %161 = vector.broadcast %160 : vector<1x96xf32> to vector<16x96xf32>
    %162 = arith.addf %158, %161 : vector<16x96xf32>
    %163 = vector.shape_cast %162 : vector<16x96xf32> to vector<2x8x96xf32>
    %164 = arith.truncf %163 : vector<2x8x96xf32> to vector<2x8x96xbf16>
    %cst_69 = arith.constant 0.000000e+00 : f32
    %165 = vector.broadcast %cst_69 : f32 to vector<16x32xf32>
    %166 = vector.extract_strided_slice %164 {offsets = [0, 0, 0], sizes = [2, 8, 16], strides = [1, 1, 1]} : vector<2x8x96xbf16> to vector<2x8x16xbf16>
    %167 = vector.extract_strided_slice %164 {offsets = [0, 0, 32], sizes = [2, 8, 16], strides = [1, 1, 1]} : vector<2x8x96xbf16> to vector<2x8x16xbf16>
    %168 = vector.extract_strided_slice %164 {offsets = [0, 0, 64], sizes = [2, 8, 16], strides = [1, 1, 1]} : vector<2x8x96xbf16> to vector<2x8x16xbf16>
    "tpu.trace_start"() <{level = 10 : i32, message = "bqd,bkd->bqk"}> : () -> ()
    %cst_70 = arith.constant dense<0.000000e+00> : vector<2x8x8xf32>
    %169 = tpu.matmul %166, %167, %cst_70 {dimension_numbers = #tpu.dot_dimension_numbers<[2], [2], [1], [1], [0, 0, 0, 1, 1, 1], [0], [0]>} : vector<2x8x16xbf16>, vector<2x8x16xbf16>, vector<2x8x8xf32> -> vector<2x8x8xf32>
    "tpu.trace_stop"() : () -> ()
    %170 = arith.addf %169, %4 : vector<2x8x8xf32>
    %cst_71 = arith.constant dense<0xFF800000> : vector<2x8xf32>
    %171 = vector.multi_reduction <maximumf>, %170, %cst_71 [2] : vector<2x8x8xf32> to vector<2x8xf32>
    %172 = vector.shape_cast %171 : vector<2x8xf32> to vector<2x8x1xf32>
    %173 = vector.broadcast %172 : vector<2x8x1xf32> to vector<2x8x8xf32>
    %174 = arith.subf %170, %173 : vector<2x8x8xf32>
    %175 = math.exp %174 : vector<2x8x8xf32>
    %cst_72 = arith.constant dense<0.000000e+00> : vector<2x8xf32>
    %176 = vector.multi_reduction <add>, %175, %cst_72 [2] : vector<2x8x8xf32> to vector<2x8xf32>
    %177 = vector.shape_cast %176 : vector<2x8xf32> to vector<2x8x1xf32>
    %178 = tpu.reciprocal %177 {approx = true} : vector<2x8x1xf32> -> vector<2x8x1xf32>
    %179 = arith.mulf %177, %178 : vector<2x8x1xf32>
    %cst_73 = arith.constant 2.000000e+00 : f32
    %180 = vector.broadcast %cst_73 : f32 to vector<2x8x1xf32>
    %181 = arith.subf %180, %179 : vector<2x8x1xf32>
    %182 = arith.mulf %178, %181 : vector<2x8x1xf32>
    %183 = vector.broadcast %182 : vector<2x8x1xf32> to vector<2x8x8xf32>
    %184 = arith.mulf %175, %183 : vector<2x8x8xf32>
    %185 = arith.truncf %184 : vector<2x8x8xf32> to vector<2x8x8xbf16>
    "tpu.trace_start"() <{level = 10 : i32, message = "bqk,bkd->bqd"}> : () -> ()
    %cst_74 = arith.constant dense<0.000000e+00> : vector<2x8x16xf32>
    %186 = tpu.matmul %185, %168, %cst_74 {dimension_numbers = #tpu.dot_dimension_numbers<[2], [1], [1], [2], [0, 0, 0, 1, 1, 2], [0], [0]>} : vector<2x8x8xbf16>, vector<2x8x16xbf16>, vector<2x8x16xf32> -> vector<2x8x16xf32>
    "tpu.trace_stop"() : () -> ()
    %187 = vector.shape_cast %186 : vector<2x8x16xf32> to vector<16x16xf32>
    %188 = arith.truncf %187 : vector<16x16xf32> to vector<16x16xbf16>
    %c1_75 = arith.constant 1 : index
    %c0_76 = arith.constant 0 : index
    %c0_77 = arith.constant 0 : index
    %c0_78 = arith.constant 0 : index
    %189 = vector.load %arg6[%c1_75, %c0_76, %c0_77, %c0_78] : memref<2x2x16x32xbf16, #tpu.memory_space<vmem>>, vector<1x1x16x32xbf16>
    %190 = vector.shape_cast %189 : vector<1x1x16x32xbf16> to vector<16x32xbf16>
    %cst_79 = arith.constant dense<0.000000e+00> : vector<16x32xf32>
    %191 = tpu.matmul %188, %190, %cst_79 {dimension_numbers = #tpu.dot_dimension_numbers<[1], [0], [0], [1], [0, 0, 1, 1], [], []>} : vector<16x16xbf16>, vector<16x32xbf16>, vector<16x32xf32> -> vector<16x32xf32>
    %192 = arith.addf %165, %191 : vector<16x32xf32>
    %193 = vector.extract_strided_slice %164 {offsets = [0, 0, 16], sizes = [2, 8, 16], strides = [1, 1, 1]} : vector<2x8x96xbf16> to vector<2x8x16xbf16>
    %194 = vector.extract_strided_slice %164 {offsets = [0, 0, 48], sizes = [2, 8, 16], strides = [1, 1, 1]} : vector<2x8x96xbf16> to vector<2x8x16xbf16>
    %195 = vector.extract_strided_slice %164 {offsets = [0, 0, 80], sizes = [2, 8, 16], strides = [1, 1, 1]} : vector<2x8x96xbf16> to vector<2x8x16xbf16>
    "tpu.trace_start"() <{level = 10 : i32, message = "bqd,bkd->bqk"}> : () -> ()
    %cst_80 = arith.constant dense<0.000000e+00> : vector<2x8x8xf32>
    %196 = tpu.matmul %193, %194, %cst_80 {dimension_numbers = #tpu.dot_dimension_numbers<[2], [2], [1], [1], [0, 0, 0, 1, 1, 1], [0], [0]>} : vector<2x8x16xbf16>, vector<2x8x16xbf16>, vector<2x8x8xf32> -> vector<2x8x8xf32>
    "tpu.trace_stop"() : () -> ()
    %197 = arith.addf %196, %4 : vector<2x8x8xf32>
    %cst_81 = arith.constant dense<0xFF800000> : vector<2x8xf32>
    %198 = vector.multi_reduction <maximumf>, %197, %cst_81 [2] : vector<2x8x8xf32> to vector<2x8xf32>
    %199 = vector.shape_cast %198 : vector<2x8xf32> to vector<2x8x1xf32>
    %200 = vector.broadcast %199 : vector<2x8x1xf32> to vector<2x8x8xf32>
    %201 = arith.subf %197, %200 : vector<2x8x8xf32>
    %202 = math.exp %201 : vector<2x8x8xf32>
    %cst_82 = arith.constant dense<0.000000e+00> : vector<2x8xf32>
    %203 = vector.multi_reduction <add>, %202, %cst_82 [2] : vector<2x8x8xf32> to vector<2x8xf32>
    %204 = vector.shape_cast %203 : vector<2x8xf32> to vector<2x8x1xf32>
    %205 = tpu.reciprocal %204 {approx = true} : vector<2x8x1xf32> -> vector<2x8x1xf32>
    %206 = arith.mulf %204, %205 : vector<2x8x1xf32>
    %cst_83 = arith.constant 2.000000e+00 : f32
    %207 = vector.broadcast %cst_83 : f32 to vector<2x8x1xf32>
    %208 = arith.subf %207, %206 : vector<2x8x1xf32>
    %209 = arith.mulf %205, %208 : vector<2x8x1xf32>
    %210 = vector.broadcast %209 : vector<2x8x1xf32> to vector<2x8x8xf32>
    %211 = arith.mulf %202, %210 : vector<2x8x8xf32>
    %212 = arith.truncf %211 : vector<2x8x8xf32> to vector<2x8x8xbf16>
    "tpu.trace_start"() <{level = 10 : i32, message = "bqk,bkd->bqd"}> : () -> ()
    %cst_84 = arith.constant dense<0.000000e+00> : vector<2x8x16xf32>
    %213 = tpu.matmul %212, %195, %cst_84 {dimension_numbers = #tpu.dot_dimension_numbers<[2], [1], [1], [2], [0, 0, 0, 1, 1, 2], [0], [0]>} : vector<2x8x8xbf16>, vector<2x8x16xbf16>, vector<2x8x16xf32> -> vector<2x8x16xf32>
    "tpu.trace_stop"() : () -> ()
    %214 = vector.shape_cast %213 : vector<2x8x16xf32> to vector<16x16xf32>
    %215 = arith.truncf %214 : vector<16x16xf32> to vector<16x16xbf16>
    %c1_85 = arith.constant 1 : index
    %c1_86 = arith.constant 1 : index
    %c0_87 = arith.constant 0 : index
    %c0_88 = arith.constant 0 : index
    %216 = vector.load %arg6[%c1_85, %c1_86, %c0_87, %c0_88] : memref<2x2x16x32xbf16, #tpu.memory_space<vmem>>, vector<1x1x16x32xbf16>
    %217 = vector.shape_cast %216 : vector<1x1x16x32xbf16> to vector<16x32xbf16>
    %cst_89 = arith.constant dense<0.000000e+00> : vector<16x32xf32>
    %218 = tpu.matmul %215, %217, %cst_89 {dimension_numbers = #tpu.dot_dimension_numbers<[1], [0], [0], [1], [0, 0, 1, 1], [], []>} : vector<16x16xbf16>, vector<16x32xbf16>, vector<16x32xf32> -> vector<16x32xf32>
    %219 = arith.addf %192, %218 : vector<16x32xf32>
    %220 = arith.addf %152, %219 : vector<16x32xf32>
    %221 = vector.extract_strided_slice %154 {offsets = [0, 0], sizes = [1, 32], strides = [1, 1]} : vector<6x32xf32> to vector<1x32xf32>
    %222 = vector.broadcast %221 : vector<1x32xf32> to vector<16x32xf32>
    %223 = arith.addf %220, %222 : vector<16x32xf32>
    %224 = vector.extract_strided_slice %154 {offsets = [1, 0], sizes = [1, 32], strides = [1, 1]} : vector<6x32xf32> to vector<1x32xf32>
    %225 = vector.extract_strided_slice %154 {offsets = [2, 0], sizes = [1, 32], strides = [1, 1]} : vector<6x32xf32> to vector<1x32xf32>
    %cst_90 = arith.constant dense<0.000000e+00> : vector<16xf32>
    %226 = vector.multi_reduction <add>, %223, %cst_90 [1] : vector<16x32xf32> to vector<16xf32>
    %227 = vector.shape_cast %226 : vector<16xf32> to vector<16x1xf32>
    %cst_91 = arith.constant 3.200000e+01 : f32
    %228 = vector.broadcast %cst_91 : f32 to vector<16x1xf32>
    %229 = arith.divf %227, %228 : vector<16x1xf32>
    %230 = vector.broadcast %229 : vector<16x1xf32> to vector<16x32xf32>
    %231 = arith.subf %223, %230 : vector<16x32xf32>
    %232 = arith.mulf %231, %231 : vector<16x32xf32>
    %cst_92 = arith.constant dense<0.000000e+00> : vector<16xf32>
    %233 = vector.multi_reduction <add>, %232, %cst_92 [1] : vector<16x32xf32> to vector<16xf32>
    %234 = vector.shape_cast %233 : vector<16xf32> to vector<16x1xf32>
    %cst_93 = arith.constant 3.200000e+01 : f32
    %235 = vector.broadcast %cst_93 : f32 to vector<16x1xf32>
    %236 = arith.divf %234, %235 : vector<16x1xf32>
    %237 = vector.broadcast %229 : vector<16x1xf32> to vector<16x32xf32>
    %238 = arith.subf %223, %237 : vector<16x32xf32>
    %cst_94 = arith.constant 9.99999996E-13 : f32
    %239 = vector.broadcast %cst_94 : f32 to vector<16x1xf32>
    %240 = arith.addf %236, %239 : vector<16x1xf32>
    %241 = math.rsqrt %240 : vector<16x1xf32>
    %242 = vector.broadcast %241 : vector<16x1xf32> to vector<16x32xf32>
    %243 = arith.mulf %238, %242 : vector<16x32xf32>
    %244 = vector.broadcast %224 : vector<1x32xf32> to vector<16x32xf32>
    %245 = arith.mulf %243, %244 : vector<16x32xf32>
    %246 = vector.broadcast %225 : vector<1x32xf32> to vector<16x32xf32>
    %247 = arith.addf %245, %246 : vector<16x32xf32>
    %248 = arith.truncf %247 : vector<16x32xf32> to vector<16x32xbf16>
    %c1_95 = arith.constant 1 : index
    %c0_96 = arith.constant 0 : index
    %c0_97 = arith.constant 0 : index
    %249 = vector.load %arg7[%c1_95, %c0_96, %c0_97] : memref<2x32x64xbf16, #tpu.memory_space<vmem>>, vector<1x32x64xbf16>
    %250 = vector.shape_cast %249 : vector<1x32x64xbf16> to vector<32x64xbf16>
    %cst_98 = arith.constant dense<0.000000e+00> : vector<16x64xf32>
    %251 = tpu.matmul %248, %250, %cst_98 {dimension_numbers = #tpu.dot_dimension_numbers<[1], [0], [0], [1], [0, 0, 1, 1], [], []>} : vector<16x32xbf16>, vector<32x64xbf16>, vector<16x64xf32> -> vector<16x64xf32>
    %c1_99 = arith.constant 1 : index
    %c0_100 = arith.constant 0 : index
    %c0_101 = arith.constant 0 : index
    %252 = vector.load %arg8[%c1_99, %c0_100, %c0_101] : memref<2x1x64xf32, #tpu.memory_space<vmem>>, vector<1x1x64xf32>
    %253 = vector.shape_cast %252 : vector<1x1x64xf32> to vector<1x64xf32>
    %254 = vector.broadcast %253 : vector<1x64xf32> to vector<16x64xf32>
    %255 = arith.addf %251, %254 : vector<16x64xf32>
    %256 = arith.mulf %255, %255 : vector<16x64xf32>
    %257 = arith.mulf %255, %256 : vector<16x64xf32>
    %cst_102 = arith.constant 4.471500e-02 : f32
    %258 = vector.broadcast %cst_102 : f32 to vector<16x64xf32>
    %259 = arith.mulf %258, %257 : vector<16x64xf32>
    %260 = arith.addf %255, %259 : vector<16x64xf32>
    %cst_103 = arith.constant 0.797884583 : f32
    %261 = vector.broadcast %cst_103 : f32 to vector<16x64xf32>
    %262 = arith.mulf %261, %260 : vector<16x64xf32>
    %263 = math.tanh %262 : vector<16x64xf32>
    %cst_104 = arith.constant 1.000000e+00 : f32
    %264 = vector.broadcast %cst_104 : f32 to vector<16x64xf32>
    %265 = arith.addf %264, %263 : vector<16x64xf32>
    %cst_105 = arith.constant 5.000000e-01 : f32
    %266 = vector.broadcast %cst_105 : f32 to vector<16x64xf32>
    %267 = arith.mulf %266, %265 : vector<16x64xf32>
    %268 = arith.mulf %255, %267 : vector<16x64xf32>
    %269 = arith.truncf %268 : vector<16x64xf32> to vector<16x64xbf16>
    %c1_106 = arith.constant 1 : index
    %c0_107 = arith.constant 0 : index
    %c0_108 = arith.constant 0 : index
    %270 = vector.load %arg9[%c1_106, %c0_107, %c0_108] : memref<2x64x32xbf16, #tpu.memory_space<vmem>>, vector<1x64x32xbf16>
    %271 = vector.shape_cast %270 : vector<1x64x32xbf16> to vector<64x32xbf16>
    %cst_109 = arith.constant dense<0.000000e+00> : vector<16x32xf32>
    %272 = tpu.matmul %269, %271, %cst_109 {dimension_numbers = #tpu.dot_dimension_numbers<[1], [0], [0], [1], [0, 0, 1, 1], [], []>} : vector<16x64xbf16>, vector<64x32xbf16>, vector<16x32xf32> -> vector<16x32xf32>
    %273 = arith.addf %247, %272 : vector<16x32xf32>
    %274 = vector.extract_strided_slice %154 {offsets = [3, 0], sizes = [1, 32], strides = [1, 1]} : vector<6x32xf32> to vector<1x32xf32>
    %275 = vector.broadcast %274 : vector<1x32xf32> to vector<16x32xf32>
    %276 = arith.addf %273, %275 : vector<16x32xf32>
    %277 = vector.extract_strided_slice %154 {offsets = [4, 0], sizes = [1, 32], strides = [1, 1]} : vector<6x32xf32> to vector<1x32xf32>
    %278 = vector.extract_strided_slice %154 {offsets = [5, 0], sizes = [1, 32], strides = [1, 1]} : vector<6x32xf32> to vector<1x32xf32>
    %cst_110 = arith.constant dense<0.000000e+00> : vector<16xf32>
    %279 = vector.multi_reduction <add>, %276, %cst_110 [1] : vector<16x32xf32> to vector<16xf32>
    %280 = vector.shape_cast %279 : vector<16xf32> to vector<16x1xf32>
    %cst_111 = arith.constant 3.200000e+01 : f32
    %281 = vector.broadcast %cst_111 : f32 to vector<16x1xf32>
    %282 = arith.divf %280, %281 : vector<16x1xf32>
    %283 = vector.broadcast %282 : vector<16x1xf32> to vector<16x32xf32>
    %284 = arith.subf %276, %283 : vector<16x32xf32>
    %285 = arith.mulf %284, %284 : vector<16x32xf32>
    %cst_112 = arith.constant dense<0.000000e+00> : vector<16xf32>
    %286 = vector.multi_reduction <add>, %285, %cst_112 [1] : vector<16x32xf32> to vector<16xf32>
    %287 = vector.shape_cast %286 : vector<16xf32> to vector<16x1xf32>
    %cst_113 = arith.constant 3.200000e+01 : f32
    %288 = vector.broadcast %cst_113 : f32 to vector<16x1xf32>
    %289 = arith.divf %287, %288 : vector<16x1xf32>
    %290 = vector.broadcast %282 : vector<16x1xf32> to vector<16x32xf32>
    %291 = arith.subf %276, %290 : vector<16x32xf32>
    %cst_114 = arith.constant 9.99999996E-13 : f32
    %292 = vector.broadcast %cst_114 : f32 to vector<16x1xf32>
    %293 = arith.addf %289, %292 : vector<16x1xf32>
    %294 = math.rsqrt %293 : vector<16x1xf32>
    %295 = vector.broadcast %294 : vector<16x1xf32> to vector<16x32xf32>
    %296 = arith.mulf %291, %295 : vector<16x32xf32>
    %297 = vector.broadcast %277 : vector<1x32xf32> to vector<16x32xf32>
    %298 = arith.mulf %296, %297 : vector<16x32xf32>
    %299 = vector.broadcast %278 : vector<1x32xf32> to vector<16x32xf32>
    %300 = arith.addf %298, %299 : vector<16x32xf32>
    %301 = vector.shape_cast %300 : vector<16x32xf32> to vector<2x8x32xf32>
    %302 = arith.truncf %301 : vector<2x8x32xf32> to vector<2x8x32xbf16>
    %c0_115 = arith.constant 0 : index
    %c0_116 = arith.constant 0 : index
    %c0_117 = arith.constant 0 : index
    %303 = vector.load %arg3[%c0_115, %c0_116, %c0_117] : memref<2x1x8xbf16, #tpu.memory_space<vmem>>, vector<2x1x8xbf16>
    "tpu.trace_start"() <{level = 10 : i32, message = "bps,bsh->bph"}> : () -> ()
    %cst_118 = arith.constant dense<0.000000e+00> : vector<2x1x32xf32>
    %304 = tpu.matmul %303, %302, %cst_118 {dimension_numbers = #tpu.dot_dimension_numbers<[2], [1], [1], [2], [0, 0, 0, 1, 1, 2], [0], [0]>} : vector<2x1x8xbf16>, vector<2x8x32xbf16>, vector<2x1x32xf32> -> vector<2x1x32xf32>
    "tpu.trace_stop"() : () -> ()
    %305 = arith.extf %303 : vector<2x1x8xbf16> to vector<2x1x8xf32>
    %cst_119 = arith.constant dense<0.000000e+00> : vector<2x1xf32>
    %306 = vector.multi_reduction <add>, %305, %cst_119 [2] : vector<2x1x8xf32> to vector<2x1xf32>
    %307 = vector.shape_cast %306 : vector<2x1xf32> to vector<2x1x1xf32>
    %cst_120 = arith.constant 9.99999971E-10 : f32
    %308 = vector.broadcast %cst_120 : f32 to vector<2x1x1xf32>
    %309 = arith.maximumf %307, %308 : vector<2x1x1xf32>
    %310 = tpu.reciprocal %309 {approx = true} : vector<2x1x1xf32> -> vector<2x1x1xf32>
    %311 = arith.mulf %309, %310 : vector<2x1x1xf32>
    %cst_121 = arith.constant 2.000000e+00 : f32
    %312 = vector.broadcast %cst_121 : f32 to vector<2x1x1xf32>
    %313 = arith.subf %312, %311 : vector<2x1x1xf32>
    %314 = arith.mulf %310, %313 : vector<2x1x1xf32>
    %315 = vector.broadcast %314 : vector<2x1x1xf32> to vector<2x1x32xf32>
    %316 = arith.mulf %304, %315 : vector<2x1x32xf32>
    %c0_122 = arith.constant 0 : index
    %c0_123 = arith.constant 0 : index
    %c0_124 = arith.constant 0 : index
    %317 = vector.load %arg11[%c0_122, %c0_123, %c0_124] : memref<2x1x32xf32, #tpu.memory_space<vmem>>, vector<2x1x32xf32>
    tpu.vector_store %arg11[%c0_122, %c0_123, %c0_124], %316 {strides = array<i32>} : memref<2x1x32xf32, #tpu.memory_space<vmem>>, vector<2x1x32xf32>,
    return
  }
  func.func @transform_0(%arg0: i32) -> (i32, i32, i32) {
    %c0_i32 = arith.constant 0 : i32
    %c0_i32_0 = arith.constant 0 : i32
    %c0_i32_1 = arith.constant 0 : i32
    return %arg0, %c0_i32, %c0_i32_0 : i32, i32, i32
  }
  func.func @transform_1(%arg0: i32) -> (i32, i32, i32) {
    %c0_i32 = arith.constant 0 : i32
    %c0_i32_0 = arith.constant 0 : i32
    %c0_i32_1 = arith.constant 0 : i32
    return %arg0, %c0_i32, %c0_i32_0 : i32, i32, i32
  }
  func.func @transform_2(%arg0: i32) -> (i32, i32, i32) {
    %c0_i32 = arith.constant 0 : i32
    %c0_i32_0 = arith.constant 0 : i32
    %c0_i32_1 = arith.constant 0 : i32
    return %arg0, %c0_i32, %c0_i32_0 : i32, i32, i32
  }
  func.func @transform_3(%arg0: i32) -> (i32, i32, i32) {
    %c0_i32 = arith.constant 0 : i32
    %c0_i32_0 = arith.constant 0 : i32
    %c0_i32_1 = arith.constant 0 : i32
    %c0_i32_2 = arith.constant 0 : i32
    return %c0_i32, %c0_i32_0, %c0_i32_1 : i32, i32, i32
  }
  func.func @transform_4(%arg0: i32) -> (i32, i32, i32) {
    %c0_i32 = arith.constant 0 : i32
    %c0_i32_0 = arith.constant 0 : i32
    %c0_i32_1 = arith.constant 0 : i32
    %c0_i32_2 = arith.constant 0 : i32
    return %c0_i32, %c0_i32_0, %c0_i32_1 : i32, i32, i32
  }
  func.func @transform_5(%arg0: i32) -> (i32, i32, i32, i32) {
    %c0_i32 = arith.constant 0 : i32
    %c0_i32_0 = arith.constant 0 : i32
    %c0_i32_1 = arith.constant 0 : i32
    %c0_i32_2 = arith.constant 0 : i32
    %c0_i32_3 = arith.constant 0 : i32
    return %c0_i32, %c0_i32_0, %c0_i32_1, %c0_i32_2 : i32, i32, i32, i32
  }
  func.func @transform_6(%arg0: i32) -> (i32, i32, i32) {
    %c0_i32 = arith.constant 0 : i32
    %c0_i32_0 = arith.constant 0 : i32
    %c0_i32_1 = arith.constant 0 : i32
    %c0_i32_2 = arith.constant 0 : i32
    return %c0_i32, %c0_i32_0, %c0_i32_1 : i32, i32, i32
  }
  func.func @transform_7(%arg0: i32) -> (i32, i32, i32) {
    %c0_i32 = arith.constant 0 : i32
    %c0_i32_0 = arith.constant 0 : i32
    %c0_i32_1 = arith.constant 0 : i32
    %c0_i32_2 = arith.constant 0 : i32
    return %c0_i32, %c0_i32_0, %c0_i32_1 : i32, i32, i32
  }
  func.func @transform_8(%arg0: i32) -> (i32, i32, i32) {
    %c0_i32 = arith.constant 0 : i32
    %c0_i32_0 = arith.constant 0 : i32
    %c0_i32_1 = arith.constant 0 : i32
    %c0_i32_2 = arith.constant 0 : i32
    return %c0_i32, %c0_i32_0, %c0_i32_1 : i32, i32, i32
  }
  func.func @transform_9(%arg0: i32) -> (i32, i32, i32) {
    %c0_i32 = arith.constant 0 : i32
    %c0_i32_0 = arith.constant 0 : i32
    %c0_i32_1 = arith.constant 0 : i32
    %c0_i32_2 = arith.constant 0 : i32
    return %c0_i32, %c0_i32_0, %c0_i32_1 : i32, i32, i32
  }
  func.func @transform_10(%arg0: i32) -> (i32, i32, i32) {
    %c0_i32 = arith.constant 0 : i32
    %c0_i32_0 = arith.constant 0 : i32
    %c0_i32_1 = arith.constant 0 : i32
    return %arg0, %c0_i32, %c0_i32_0 : i32, i32, i32
  }
}

</mosaic_0001>

<bundles_post_ra>
// kernel: tpu_custom_call.1
= control target key start
LH: loop header
LB: loop body
LE: loop exit
PB: predicated region body
PF: predicated region fallthrough
CT: control target
= control target key end

     0   :  { %15 = vsyncpa [#allocation3], 0  ;;  %s2960_s0 = inlined_call_operand.vmem [shape: f32[2,8,32], index: 0, kind: input, shape index: {}]   ;;  %s2961_s1 = inlined_call_operand.vmem [shape: f32[2,1,8], index: 1, kind: input, shape index: {}]   ;;  %s2962_s2 = inlined_call_operand.vmem [shape: bf16[2,1,8], index: 2, kind: input, shape index: {}]   ;;  %s2963_s3 = inlined_call_operand.vmem [shape: bf16[2,32,96], index: 3, kind: input, shape index: {}]   ;;  %s2964_s4 = inlined_call_operand.vmem [shape: f32[2,1,96], index: 4, kind: input, shape index: {}]   ;;  %s2965_s5 = inlined_call_operand.vmem [shape: bf16[2,2,16,32], index: 5, kind: input, shape index: {}]   ;;  %s2966_s6 = inlined_call_operand.vmem [shape: bf16[2,32,64], index: 6, kind: input, shape index: {}]   ;;  %s2967_s7 = inlined_call_operand.hbm [shape: f32[2,1,64], index: 7, kind: input, shape index: {}]   ;;  %s2968_s8 = inlined_call_operand.vmem [shape: bf16[2,64,32], index: 8, kind: input, shape index: {}]   ;;  %s2969_s9 = inlined_call_operand.vmem [shape: f32[2,6,32], index: 9, kind: input, shape index: {}]   ;;  %s2970_s10 = inlined_call_operand.hbm [shape: f32[2,1,32], index: 10, kind: output, shape index: {}]  }
   0x1   :  { %16 = vsyncpa [#allocation4], 0  ;;  %s2454_s13 = smov [#allocation2]   ;;  %s2406_s17 = scalar_lea.hbm %s2967_s7, 32 }
   0x2   :  { %s36_s14 = sshll.u32 %s2454_s13, 4  ;;  %p2407_p0 = scmp.ne.s32.totalorder %s2967_s7, %s2406_s17  ;;  %s37_s14 = int_to_ptr.vmem [resolvable:$true] %s36_s14 }
   0x3   :  { %p2410_p1 = scmp.lt.u32.totalorder %s2406_s17, %s2967_s7 }
   0x5   :  { %p2412_p2 = pnand %p2410_p1, %p2407_p0 }
   0x7   :  { %2415 = shalt.err (!%p2412_p2)
}
   0x8   :  { %s2416_s22 = scalar_lea.vmem %s37_s14, 32  ;;  %p2421_p4 = scmp.lt.s32.totalorder %s37_s14, %s37_s14 }
   0x9   :  { %p2417_p3 = scmp.ne.s32.totalorder %s37_s14, %s2416_s22  ;;  %p2422_p5 = scmp.lt.s32.totalorder %s2416_s22, %s2416_s22 }
   0xb   :  { %p2423_p6 = por %p2422_p5, %p2421_p4 }
   0xd   :  { %p2424_p7 = pnand %p2423_p6, %p2417_p3 }
   0xf   :  { %2427 = shalt.err (!%p2424_p7)
}
  0x10   :  { %s2455_s23 = smov 16   ;;  %s2456_s24 = smov 1  }
  0x11   :  { %42 = dma.hbm_to_vmem [thread:$0]  %s2967_s7, 32, %s37_s14, [#allocation3], %s2455_s23, %s2455_s23, %s2456_s24  }
  0x12   :  { %2450 = dma.done.wait [#allocation3], 32  }
  0x13   :  { %2451 = vsyncadd [#allocation3], 4294967264  ;;  %v2457_v0 = vmov 0.0   ;;  %vm2458_vm0 = vmmov 0   ;;  %v2326_v1 = vld [vmem:[%s2963_s3] sm:$0xff]   ;;  %v2327_v2 = vld [vmem:[%s2963_s3 + $0x8] sm:$0xff]  }
  0x14   :  { %2127 = vmatprep.subr.bf16.mxu0 %v2457_v0  ;;  %2131 = vmatprep.mubr.msk.bf16.mxu0 %vm2458_vm0, %v2457_v0  ;;  %v2550_v3 = vld [vmem:[%s2960_s0] sm:$0xff]  ;;  %v2555_v4 = vld [vmem:[%s2960_s0 + $0x8] sm:$0xff]  ;;  %vm92_vm1 = vcmask 261120   ;;  %s2459_s0 = smov 96   ;;  %vm142_vm2 = vcmask 130048   ;;  %vm238_vm3 = vcmask 64512  }
  0x15   :  { %2135 = vmatprep.subr.bf16.mxu1 %v2457_v0  ;;  %2137 = vmatprep.mubr.msk.bf16.mxu1 %vm2458_vm0, %v2457_v0  ;;  %v68_v5 = vpack.c.bf16 %v2555_v4, %v2550_v3  ;;  %v1985_v6 = vld [vmem:[%s2964_s4] ss:$0 sm:$0xff]  ;;  %v2596_v24 = vld [vmem:[%s2961_s1 + $0x1] ss:$0 sm:$0xff]  ;;  %s2460_s20 = smov 64   ;;  %vm274_vm4 = vcmask 1043456  }
  0x16   :  { %2128 = vmatpush3.bf16.msra.mxu0 %v2326_v1  ;;  %v2590_v19 = vld [vmem:[%s2961_s1] ss:$0 sm:$0xff]  ;;  %s2461_s1 = smov 80   ;;  %s2462_s21 = smov 112   ;;  %vm865_vm5 = vcmask 523264   ;;  %vm1944_vm6 = vcmask 57344  }
  0x17   :  { %2129 = vmatprep.subr.bf16.mxu0 %v2457_v0  ;;  %s2463_s22 = smov 48   ;;  %vm1963_vm7 = vcmask 253952  }
  0x1a   :  { %2130 = vmatpush3.bf16.msra.mxu0 %v2327_v2 }
  0x1b   :  { %2141 = vmatprep.subr.bf16.mxu0 %v2457_v0 }
  0x1d   :  { %2132 = vmatmul.mubr.msk.bf16.vlgmr.msra.gmra.mrb[0].mxu0 %vm92_vm1, %v68_v5 }
  0x1e   :  { %2143 = vmatprep.mubr.msk.bf16.mxu0 %vm2458_vm0, %v2457_v0 }
  0xf0   :  { %v130_v7 = vpop.f32.mrb[0].mxu0 }
  0xf1   :  { %v131_v8 = vadd.f32 %v1985_v6, %v130_v7  ;;  %v2133_v9 = vpop.f32.mrb[1].mxu0 }
  0xf2   :  { %v133_v10 = vpop.f32.mrb[2].mxu0 }
  0xf3   :  { %v2567_v11 = vpack.c.bf16 %v131_v8, %v131_v8  ;;  %v134_v12 = vadd.f32 %v1985_v6, %v133_v10  ;;  %v2134_v13 = vpop.f32.mrb[3].mxu0 }
  0xf5   :  { %140 = vrot.lane.b32.xlu0 %v2567_v11, %s2459_s0  ;;  %v2571_v14 = vpack.c.bf16 %v134_v12, %v134_v12 }
  0xf9   :  { %190 = vrot.lane.b32.xlu0 %v2571_v14, %s2459_s0 }
 0x167   :  { %v141_v15 = vpop.permute.xlu0 %140 }
 0x168   :  { %v147_v16 = vsel %vm142_vm2, %v141_v15, 0 }
 0x169   :  { %2136 = vmatpush3.bf16.xpose.msra.mxu1 %v147_v16 }
 0x16a   :  { %2147 = vmatprep.subr.bf16.mxu1 %v2457_v0 }
 0x16b   :  { %v191_v17 = vpop.permute.xlu0 %190 }
 0x16c   :  { %v196_v18 = vsel %vm142_vm2, %v191_v17, 0 }
 0x16d   :  { %2142 = vmatpush3.bf16.xpose.msra.mxu0 %v196_v18 }
 0x16e   :  { %2153 = vmatprep.subr.bf16.mxu0 %v2457_v0 }
 0x170   :  { %2138 = vmatmul.mubr.msk.bf16.vlgmr.msra.gmra.mrb[0].mxu1 %vm142_vm2, %v2567_v11 }
 0x171   :  { %2149 = vmatprep.mubr.msk.bf16.mxu1 %vm2458_vm0, %v2457_v0 }
 0x174   :  { %2144 = vmatmul.mubr.msk.bf16.vlgmr.msra.gmra.mrb[4].mxu0 %vm142_vm2, %v2571_v14 }
 0x175   :  { %2155 = vmatprep.mubr.msk.bf16.mxu0 %vm2458_vm0, %v2457_v0 }
 0x243   :  { %v183_v20 = vpop.f32.mrb[0].mxu1 }
 0x244   :  { %v184_v21 = vadd.f32 %v2590_v19, %v183_v20  ;;  %v2139_v22 = vpop.f32.mrb[1].mxu1 }
 0x245   :  { %v186_v23 = vpop.f32.mrb[2].mxu1 }
 0x246   :  { %v2140_v25 = vpop.f32.mrb[3].mxu1  ;;  %v239_v26 = vsel %vm238_vm3, %v184_v21, -inf }
 0x247   :  { %240 = vmax.xlane.f32.xlu1 %v239_v26  ;;  %v232_v27 = vpop.f32.mrb[4].mxu0 }
 0x248   :  { %v233_v28 = vadd.f32 %v2596_v24, %v232_v27  ;;  %v2145_v29 = vpop.f32.mrb[5].mxu0 }
 0x249   :  { %v235_v30 = vpop.f32.mrb[6].mxu0 }
 0x24a   :  { %v2146_v31 = vpop.f32.mrb[7].mxu0  ;;  %v242_v32 = vsel %vm238_vm3, %v233_v28, -inf }
 0x24b   :  { %243 = vmax.xlane.f32.xlu1 %v242_v32 }
 0x25c   :  { %269 = vrot.lane.b32.xlu1 %v2567_v11, %s2460_s20 }
 0x260   :  { %318 = vrot.lane.b32.xlu1 %v2571_v14, %s2460_s20 }
 0x264   :  { %371 = vrot.lane.b32.xlu1 %v2567_v11, %s2461_s1 }
 0x2d4   :  { %v241_v33 = vpop.xlane.xlu1 %240 }
 0x2d5   :  { %v245_v34 = vsub.f32 %v184_v21, %v241_v33 }
 0x2d7   :  { %v247_v35 = vmul.f32 1.442695, %v245_v34 }
 0x2d8   :  { %v244_v36 = vpop.xlane.xlu1 %243 }
 0x2d9   :  { %2346 = vpow2.f32 %v247_v35  ;;  %v246_v37 = vsub.f32 %v233_v28, %v244_v36 }
 0x2db   :  { %v249_v38 = vmul.f32 1.442695, %v246_v37 }
 0x2dc   :  { %v270_v39 = vpop.permute.xlu1 %269 }
 0x2dd   :  { %2348 = vpow2.f32 %v249_v38  ;;  %v276_v40 = vsel %vm274_vm4, %v270_v39, 0 }
 0x2de   :  { %2148 = vmatpush3.bf16.msra.mxu1 %v276_v40 }
 0x2df   :  { %2159 = vmatprep.subr.bf16.mxu1 %v2457_v0 }
 0x2e0   :  { %v319_v41 = vpop.permute.xlu1 %318 }
 0x2e1   :  { %v324_v42 = vsel %vm274_vm4, %v319_v41, 0 }
 0x2e2   :  { %2154 = vmatpush3.bf16.msra.mxu0 %v324_v42 }
 0x2e3   :  { %v2347_v43 = vpop.eup %2346  ;;  %2165 = vmatprep.subr.bf16.mxu0 %v2457_v0 }
 0x2e4   :  { %v251_v44 = vsel %vm238_vm3, %v2347_v43, 0.0  ;;  %v372_v47 = vpop.permute.xlu1 %371 }
 0x2e5   :  { %252 = vadd.xlane.f32.xlu0 %v251_v44  ;;  %v377_v60 = vsel %vm142_vm2, %v372_v47, 0 }
 0x2e7   :  { %v2349_v45 = vpop.eup %2348 }
 0x2e8   :  { %v254_v46 = vsel %vm238_vm3, %v2349_v45, 0.0 }
 0x2e9   :  { %255 = vadd.xlane.f32.xlu1 %v254_v46 }
 0x2fa   :  { %421 = vrot.lane.b32.xlu1 %v2571_v14, %s2461_s1 }
 0x2fb   :  { %369 = vrot.lane.b32.xlu0 %v2567_v11, %s2462_s21 }
 0x2fe   :  { %419 = vrot.lane.b32.xlu1 %v2571_v14, %s2462_s21 }
 0x372   :  { %v253_v48 = vpop.xlane.xlu0 %252 }
 0x373   :  { %2350 = vrcp.f32 %v253_v48 }
 0x376   :  { %v256_v49 = vpop.xlane.xlu1 %255  ;;  %v370_v2 = vpop.permute.xlu0 %369 }
 0x377   :  { %2352 = vrcp.f32 %v256_v49 }
 0x37a   :  { %v422_v62 = vpop.permute.xlu1 %421 }
 0x37b   :  { %v427_v1 = vsel %vm142_vm2, %v422_v62, 0 }
 0x37d   :  { %v2351_v50 = vpop.eup %2350 }
 0x37e   :  { %v259_v51 = vmul.f32 %v2351_v50, %v253_v48  ;;  %v420_v5 = vpop.permute.xlu1 %419 }
 0x380   :  { %v261_v52 = vsub.f32 2.0, %v259_v51 }
 0x381   :  { %v2353_v53 = vpop.eup %2352 }
 0x382   :  { %v263_v54 = vmul.f32 %v2351_v50, %v261_v52  ;;  %v260_v55 = vmul.f32 %v2353_v53, %v256_v49 }
 0x384   :  { %v265_v56 = vmul.f32 %v2347_v43, %v263_v54  ;;  %v262_v57 = vsub.f32 2.0, %v260_v55 }
 0x386   :  { %v267_v58 = vpack.c.bf16 %v265_v56, %v265_v56  ;;  %v264_v59 = vmul.f32 %v2353_v53, %v262_v57  ;;  %v2328_v56 = vld [vmem:[%s2965_s5] sm:$0xff]  }
 0x388   :  { %v266_v61 = vmul.f32 %v2349_v45, %v264_v59  ;;  %2150 = vmatmul.mubr.msk.bf16.vlgmr.msra.gmra.mrb[4].mxu1 %vm238_vm3, %v267_v58  ;;  %v2329_v58 = vld [vmem:[%s2965_s5 + $0x8] sm:$0xff]  }
 0x389   :  { %2160 = vmatpush3.bf16.xpose.msra.mxu1 %v377_v60  ;;  %2161 = vmatprep.mubr.msk.bf16.mxu1 %vm2458_vm0, %v2457_v0 }
 0x38a   :  { %v268_v63 = vpack.c.bf16 %v266_v61, %v266_v61  ;;  %2171 = vmatprep.subr.bf16.mxu1 %v2457_v0 }
 0x38c   :  { %2156 = vmatmul.mubr.msk.bf16.vlgmr.msra.gmra.mrb[8].mxu0 %vm238_vm3, %v268_v63 }
 0x38d   :  { %2166 = vmatpush3.bf16.xpose.msra.mxu0 %v427_v1  ;;  %2167 = vmatprep.mubr.msk.bf16.mxu0 %vm2458_vm0, %v2457_v0 }
 0x38e   :  { %2177 = vmatprep.subr.bf16.mxu0 %v2457_v0 }
 0x390   :  { %2162 = vmatmul.mubr.msk.bf16.vlgmr.msra.gmra.mrb[8].mxu1 %vm142_vm2, %v370_v2 }
 0x391   :  { %2173 = vmatprep.mubr.msk.bf16.mxu1 %vm2458_vm0, %v2457_v0 }
 0x394   :  { %2168 = vmatmul.mubr.msk.bf16.vlgmr.msra.gmra.mrb[12].mxu0 %vm142_vm2, %v420_v5 }
 0x395   :  { %2179 = vmatprep.mubr.msk.bf16.mxu0 %vm2458_vm0, %v2457_v0 }
 0x45b   :  { %v2635_v6 = vpop.f32.mrb[4].mxu1 }
 0x45c   :  { %v2151_v7 = vpop.f32.mrb[5].mxu1 }
 0x45d   :  { %v315_v8 = vpop.f32.mrb[6].mxu1 }
 0x45e   :  { %v2152_v9 = vpop.f32.mrb[7].mxu1 }
 0x45f   :  { %v2637_v10 = vpop.f32.mrb[8].mxu0 }
 0x460   :  { %v366_v12 = vpack.c.bf16 %v2637_v10, %v2635_v6  ;;  %v2157_v13 = vpop.f32.mrb[9].mxu0 }
 0x461   :  { %v363_v15 = vpop.f32.mrb[10].mxu0 }
 0x462   :  { %v2158_v16 = vpop.f32.mrb[11].mxu0 }
 0x463   :  { %v413_v17 = vpop.f32.mrb[8].mxu1  ;;  %v2684_v16 = vld [vmem:[%s2969_s9] sm:$0x3f] }
 0x464   :  { %v414_v18 = vadd.f32 %v2590_v19, %v413_v17  ;;  %v2163_v20 = vpop.f32.mrb[9].mxu1 }
 0x465   :  { %v416_v21 = vpop.f32.mrb[10].mxu1 }
 0x466   :  { %v2164_v22 = vpop.f32.mrb[11].mxu1  ;;  %v469_v23 = vsel %vm238_vm3, %v414_v18, -inf }
 0x467   :  { %470 = vmax.xlane.f32.xlu1 %v469_v23  ;;  %v463_v25 = vpop.f32.mrb[12].mxu0 }
 0x468   :  { %v464_v26 = vadd.f32 %v2596_v24, %v463_v25  ;;  %v2169_v27 = vpop.f32.mrb[13].mxu0 }
 0x469   :  { %v466_v28 = vpop.f32.mrb[14].mxu0 }
 0x46a   :  { %v2170_v29 = vpop.f32.mrb[15].mxu0  ;;  %v472_v30 = vsel %vm238_vm3, %v464_v26, -inf }
 0x46b   :  { %473 = vmax.xlane.f32.xlu0 %v472_v30 }
 0x481   :  { %547 = vrot.lane.b32.xlu0 %v2571_v14, %s2463_s22 }
 0x4f4   :  { %v471_v31 = vpop.xlane.xlu1 %470 }
 0x4f5   :  { %v475_v32 = vsub.f32 %v414_v18, %v471_v31 }
 0x4f7   :  { %v477_v33 = vmul.f32 1.442695, %v475_v32 }
 0x4f8   :  { %v474_v34 = vpop.xlane.xlu0 %473 }
 0x4f9   :  { %2354 = vpow2.f32 %v477_v33  ;;  %v476_v35 = vsub.f32 %v464_v26, %v474_v34 }
 0x4fb   :  { %v479_v36 = vmul.f32 1.442695, %v476_v35 }
 0x4fc   :  { %v548_v37 = vpop.permute.xlu0 %547 }
 0x4fd   :  { %2356 = vpow2.f32 %v479_v36  ;;  %v553_v38 = vsel %vm274_vm4, %v548_v37, 0 }
 0x4fe   :  { %2178 = vmatpush3.bf16.msra.mxu0 %v553_v38 }
 0x4ff   :  { %2189 = vmatprep.subr.bf16.mxu0 %v2457_v0 }
 0x503   :  { %v2355_v39 = vpop.eup %2354 }
 0x504   :  { %v481_v40 = vsel %vm238_vm3, %v2355_v39, 0.0 }
 0x505   :  { %482 = vadd.xlane.f32.xlu1 %v481_v40  ;;  %v2330_v40 = vld [vmem:[%s2966_s6] sm:$0xff]  }
 0x507   :  { %v2357_v41 = vpop.eup %2356 }
 0x508   :  { %v484_v14 = vsel %vm238_vm3, %v2357_v41, 0.0 }
 0x509   :  { %485 = vadd.xlane.f32.xlu1 %v484_v14 }
 0x51a   :  { %499 = vrot.lane.b32.xlu1 %v2567_v11, %s2463_s22 }
 0x592   :  { %v483_v42 = vpop.xlane.xlu1 %482 }
 0x593   :  { %2358 = vrcp.f32 %v483_v42 }
 0x596   :  { %v486_v43 = vpop.xlane.xlu1 %485 }
 0x597   :  { %2360 = vrcp.f32 %v486_v43 }
 0x59a   :  { %v500_v44 = vpop.permute.xlu1 %499 }
 0x59b   :  { %v505_v45 = vsel %vm274_vm4, %v500_v44, 0 }
 0x59c   :  { %2172 = vmatpush3.bf16.msra.mxu1 %v505_v45 }
 0x59d   :  { %v2359_v46 = vpop.eup %2358  ;;  %2183 = vmatprep.subr.bf16.mxu1 %v2457_v0 }
 0x59e   :  { %v489_v47 = vmul.f32 %v2359_v46, %v483_v42 }
 0x5a0   :  { %v491_v48 = vsub.f32 2.0, %v489_v47 }
 0x5a1   :  { %v2361_v49 = vpop.eup %2360 }
 0x5a2   :  { %v493_v50 = vmul.f32 %v2359_v46, %v491_v48  ;;  %v490_v51 = vmul.f32 %v2361_v49, %v486_v43 }
 0x5a4   :  { %v495_v52 = vmul.f32 %v2355_v39, %v493_v50  ;;  %v492_v53 = vsub.f32 2.0, %v490_v51 }
 0x5a6   :  { %v497_v54 = vpack.c.bf16 %v495_v52, %v495_v52  ;;  %v494_v11 = vmul.f32 %v2361_v49, %v492_v53 }
 0x5a8   :  { %v496_v55 = vmul.f32 %v2357_v41, %v494_v11  ;;  %2174 = vmatmul.mubr.msk.bf16.vlgmr.msra.gmra.mrb[12].mxu1 %vm238_vm3, %v497_v54  ;;  %v2331_v41 = vld [vmem:[%s2966_s6 + $0x8] sm:$0xff]  }
 0x5a9   :  { %2185 = vmatprep.mubr.msk.bf16.mxu1 %vm2458_vm0, %v2457_v0  ;;  %2184 = vmatpush3.bf16.msra.mxu1 %v2329_v58 }
 0x5aa   :  { %v498_v57 = vpack.c.bf16 %v496_v55, %v496_v55  ;;  %2195 = vmatprep.subr.bf16.mxu1 %v2457_v0 }
 0x5ac   :  { %2180 = vmatmul.mubr.msk.bf16.vlgmr.msra.gmra.mrb[16].mxu0 %vm238_vm3, %v498_v57 }
 0x5ad   :  { %2190 = vmatpush3.bf16.msra.mxu0 %v2328_v56  ;;  %2191 = vmatprep.mubr.msk.bf16.mxu0 %vm2458_vm0, %v2457_v0 }
 0x5ae   :  { %2203 = vmatprep.subr.bf16.mxu0 %v2457_v0 }
 0x5b4   :  { %2192 = vmatmul.mubr.msk.bf16.vlgmr.msra.gmra.mrb[20].mxu0 %vm142_vm2, %v366_v12  ;;  %v701_v12 = vlaneseq }
 0x5b5   :  { %2211 = vmatprep.mubr.msk.bf16.mxu0 %vm2458_vm0, %v2457_v0 }
 0x5b6   :  { %v2678_v13 = vshrl.u32 %v701_v12, 7 }
 0x5b8   :  { %v703_v15 = vsub.s32 0, %v2678_v13  ;;  %v736_v47 = vsub.s32 1, %v2678_v13  ;;  %v742_v49 = vsub.s32 2, %v2678_v13 }
 0x5ba   :  { %v704_v21 = vrot.slane %v2684_v16, %v703_v15  ;;  %v737_v48 = vrot.slane %v2684_v16, %v736_v47  ;;  %v743_v11 = vrot.slane %v2684_v16, %v742_v49 }
 0x67b   :  { %v541_v59 = vpop.f32.mrb[12].mxu1 }
 0x67c   :  { %v2175_v60 = vpop.f32.mrb[13].mxu1 }
 0x67d   :  { %v544_v61 = vpop.f32.mrb[14].mxu1  ;;  %v2333_v60 = vld [vmem:[%s2968_s8 + $0x8] sm:$0xff]  }
 0x67e   :  { %v2176_v62 = vpop.f32.mrb[15].mxu1  ;;  %v2334_v61 = vld [vmem:[%s2968_s8 + $0x10] sm:$0xff]  }
 0x67f   :  { %v589_v63 = vpop.f32.mrb[16].mxu0  ;;  %v2335_v62 = vld [vmem:[%s2968_s8 + $0x18] sm:$0xff]  }
 0x680   :  { %v595_v1 = vpack.c.bf16 %v589_v63, %v541_v59  ;;  %v2181_v2 = vpop.f32.mrb[17].mxu0  ;;  %v2332_v59 = vld [vmem:[%s2968_s8] sm:$0xff]  }
 0x681   :  { %v592_v5 = vpop.f32.mrb[18].mxu0  ;;  %2204 = vmatpush3.bf16.msra.mxu0 %v2332_v59  ;;  %v2003_v63 = vld [vmem:[#allocation2] ss:$0 sm:$0xff] }
 0x682   :  { %v2182_v6 = vpop.f32.mrb[19].mxu0  ;;  %2186 = vmatmul.mubr.msk.bf16.vlgmr.msra.gmra.mrb[16].mxu1 %vm142_vm2, %v595_v1  ;;  %2205 = vmatprep.subr.bf16.mxu0 %v2457_v0 }
 0x683   :  { %2199 = vmatprep.mubr.msk.bf16.mxu1 %vm2458_vm0, %v2457_v0  ;;  %2196 = vmatpush3.bf16.msra.mxu1 %v2330_v40 }
 0x684   :  { %2197 = vmatprep.subr.bf16.mxu1 %v2457_v0 }
 0x685   :  { %2206 = vmatpush3.bf16.msra.mxu0 %v2333_v60 }
 0x686   :  { %2207 = vmatprep.subr.bf16.mxu0 %v2457_v0 }
 0x687   :  { %v692_v7 = vpop.f32.mrb[20].mxu0  ;;  %2198 = vmatpush3.bf16.msra.mxu1 %v2331_v41 }
 0x688   :  { %v2193_v8 = vpop.f32.mrb[21].mxu0  ;;  %2215 = vmatprep.subr.bf16.mxu1 %v2457_v0 }
 0x689   :  { %v695_v9 = vpop.f32.mrb[22].mxu0  ;;  %2208 = vmatpush3.bf16.msra.mxu0 %v2334_v61 }
 0x68a   :  { %v2194_v10 = vpop.f32.mrb[23].mxu0  ;;  %2209 = vmatprep.subr.bf16.mxu0 %v2457_v0 }
 0x68d   :  { %2210 = vmatpush3.bf16.msra.mxu0 %v2335_v62 }
 0x68e   :  { %2229 = vmatprep.subr.bf16.mxu0 %v2457_v0 }
 0x755   :  { %v642_v17 = vpop.f32.mrb[16].mxu1 }
 0x756   :  { %v693_v18 = vadd.f32 %v692_v7, %v642_v17  ;;  %v2187_v20 = vpop.f32.mrb[17].mxu1 }
 0x757   :  { %v645_v22 = vpop.f32.mrb[18].mxu1 }
 0x758   :  { %v699_v23 = vadd.f32 %v693_v18, %v2550_v3  ;;  %v696_v25 = vadd.f32 %v695_v9, %v645_v22  ;;  %v2188_v26 = vpop.f32.mrb[19].mxu1 }
 0x75a   :  { %v700_v27 = vadd.f32 %v696_v25, %v2555_v4  ;;  %v705_v28 = vadd.f32 %v704_v21, %v699_v23 }
 0x75c   :  { %v707_v29 = vsel %vm92_vm1, %v705_v28, 0.0  ;;  %v706_v30 = vadd.f32 %v704_v21, %v700_v27 }
 0x75d   :  { %708 = vadd.xlane.f32.xlu1 %v707_v29 }
 0x75e   :  { %v710_v31 = vsel %vm92_vm1, %v706_v30, 0.0 }
 0x75f   :  { %711 = vadd.xlane.f32.xlu0 %v710_v31 }
 0x7ea   :  { %v709_v32 = vpop.xlane.xlu1 %708 }
 0x7eb   :  { %v714_v33 = vmul.f32 0.03125, %v709_v32 }
 0x7ec   :  { %v712_v34 = vpop.xlane.xlu0 %711 }
 0x7ed   :  { %v716_v35 = vsub.f32 %v705_v28, %v714_v33  ;;  %v715_v36 = vmul.f32 0.03125, %v712_v34 }
 0x7ef   :  { %v717_v37 = vsub.f32 %v706_v30, %v715_v36  ;;  %v718_v38 = vmul.f32 %v716_v35, %v716_v35 }
 0x7f1   :  { %v720_v3 = vsel %vm92_vm1, %v718_v38, 0.0  ;;  %v719_v39 = vmul.f32 %v717_v37, %v717_v37 }
 0x7f2   :  { %721 = vadd.xlane.f32.xlu1 %v720_v3 }
 0x7f3   :  { %v723_v4 = vsel %vm92_vm1, %v719_v39, 0.0 }
 0x7f4   :  { %724 = vadd.xlane.f32.xlu0 %v723_v4 }
 0x87f   :  { %v722_v14 = vpop.xlane.xlu1 %721 }
 0x880   :  { %v726_v42 = vmul.f32 0.03125, %v722_v14 }
 0x881   :  { %v725_v43 = vpop.xlane.xlu0 %724 }
 0x882   :  { %v728_v44 = vadd.f32 1e-12, %v726_v42  ;;  %v727_v45 = vmul.f32 0.03125, %v725_v43 }
 0x884   :  { %2362 = vrsqrt.f32 %v728_v44  ;;  %v729_v46 = vadd.f32 1e-12, %v727_v45 }
 0x886   :  { %2364 = vrsqrt.f32 %v729_v46 }
 0x88e   :  { %v2363_v50 = vpop.eup %2362 }
 0x88f   :  { %v732_v51 = vmul.f32 %v2363_v50, %v716_v35  ;;  %v914_v35 = vsub.s32 3, %v2678_v13 }
 0x890   :  { %v2365_v52 = vpop.eup %2364 }
 0x891   :  { %v738_v53 = vmul.f32 %v737_v48, %v732_v51  ;;  %v733_v54 = vmul.f32 %v2365_v52, %v717_v37  ;;  %v915_v36 = vrot.slane %v2684_v16, %v914_v35 }
 0x893   :  { %v739_v55 = vmul.f32 %v737_v48, %v733_v54  ;;  %v744_v56 = vadd.f32 %v743_v11, %v738_v53 }
 0x895   :  { %v745_v57 = vadd.f32 %v743_v11, %v739_v55  ;;  %v2336_v55 = vld [vmem:[%s2963_s3 + $0x10] sm:$0xff]  }
 0x897   :  { %v746_v58 = vpack.c.bf16 %v745_v57, %v744_v56 }
 0x899   :  { %2200 = vmatmul.mubr.msk.bf16.vlgmr.msra.gmra.mrb[20].mxu1 %vm92_vm1, %v746_v58 }
 0x89a   :  { %2219 = vmatprep.mubr.msk.bf16.mxu1 %vm2458_vm0, %v2457_v0  ;;  %2216 = vmatpush3.bf16.msra.mxu1 %v2336_v55 }
 0x89b   :  { %2217 = vmatprep.subr.bf16.mxu1 %v2457_v0 }
 0x96c   :  { %v807_v1 = vpop.f32.mrb[20].mxu1 }
 0x96d   :  { %v808_v2 = vadd.f32 %v2003_v63, %v807_v1  ;;  %v2201_v5 = vpop.f32.mrb[21].mxu1 }
 0x96e   :  { %v810_v6 = vpop.f32.mrb[22].mxu1 }
 0x96f   :  { %v814_v7 = vmul.f32 %v808_v2, %v808_v2  ;;  %v811_v8 = vadd.f32 %v2003_v63, %v810_v6  ;;  %v2202_v9 = vpop.f32.mrb[23].mxu1  ;;  %v946_v63 = vsub.s32 4, %v2678_v13 }
 0x971   :  { %v816_v10 = vmul.f32 %v814_v7, %v808_v2  ;;  %v815_v12 = vmul.f32 %v811_v8, %v811_v8  ;;  %v947_v1 = vrot.slane %v2684_v16, %v946_v63 }
 0x973   :  { %v818_v17 = vmul.f32 0.044715, %v816_v10  ;;  %v817_v18 = vmul.f32 %v815_v12, %v811_v8 }
 0x975   :  { %v820_v20 = vadd.f32 %v818_v17, %v808_v2  ;;  %v819_v21 = vmul.f32 0.044715, %v817_v18 }
 0x977   :  { %v822_v22 = vmul.f32 0.7978846, %v820_v20  ;;  %v821_v23 = vadd.f32 %v819_v21, %v811_v8  ;;  %v2018_v21 = vld [vmem:[%s2964_s4 + $0x1] ss:$0 sm:$0xff] }
 0x979   :  { %2366 = vtanh.f32 %v822_v22  ;;  %v823_v25 = vmul.f32 0.7978846, %v821_v23 }
 0x97b   :  { %2368 = vtanh.f32 %v823_v25 }
 0x983   :  { %v2367_v26 = vpop.eup %2366 }
 0x984   :  { %v826_v27 = vadd.f32 1.0, %v2367_v26 }
 0x985   :  { %v2369_v28 = vpop.eup %2368 }
 0x986   :  { %v828_v29 = vmul.f32 0.5, %v826_v27  ;;  %v827_v30 = vadd.f32 1.0, %v2369_v28 }
 0x988   :  { %v829_v31 = vmul.f32 0.5, %v827_v30  ;;  %v830_v32 = vmul.f32 %v828_v29, %v808_v2  ;;  %v952_v2 = vsub.s32 5, %v2678_v13 }
 0x98a   :  { %v831_v33 = vmul.f32 %v829_v31, %v811_v8  ;;  %v953_v10 = vrot.slane %v2684_v16, %v952_v2 }
 0x98c   :  { %v832_v34 = vpack.c.bf16 %v831_v33, %v830_v32 }
 0x98e   :  { %2212 = vmatmul.mubr.msk.bf16.vlgmr.msra.gmra.mrb[24].mxu0 %vm865_vm5, %v832_v34 }
 0x98f   :  { %2231 = vmatprep.mubr.msk.bf16.mxu0 %vm2458_vm0, %v2457_v0 }
 0xa61   :  { %v903_v37 = vpop.f32.mrb[24].mxu0 }
 0xa62   :  { %v910_v38 = vadd.f32 %v903_v37, %v744_v56  ;;  %v2213_v3 = vpop.f32.mrb[25].mxu0  ;;  %v2337_v56 = vld [vmem:[%s2963_s3 + $0x18] sm:$0xff]  }
 0xa63   :  { %v906_v39 = vpop.f32.mrb[26].mxu0  ;;  %2218 = vmatpush3.bf16.msra.mxu1 %v2337_v56 }
 0xa64   :  { %v911_v4 = vadd.f32 %v906_v39, %v745_v57  ;;  %v2214_v40 = vpop.f32.mrb[27].mxu0  ;;  %v916_v41 = vadd.f32 %v915_v36, %v910_v38  ;;  %2223 = vmatprep.subr.bf16.mxu1 %v2457_v0 }
 0xa66   :  { %v918_v14 = vsel %vm92_vm1, %v916_v41, 0.0  ;;  %v917_v42 = vadd.f32 %v915_v36, %v911_v4 }
 0xa67   :  { %919 = vadd.xlane.f32.xlu1 %v918_v14 }
 0xa68   :  { %v921_v43 = vsel %vm92_vm1, %v917_v42, 0.0 }
 0xa69   :  { %922 = vadd.xlane.f32.xlu0 %v921_v43 }
 0xaf4   :  { %v920_v44 = vpop.xlane.xlu1 %919 }
 0xaf5   :  { %v924_v45 = vmul.f32 0.03125, %v920_v44 }
 0xaf6   :  { %v923_v46 = vpop.xlane.xlu0 %922 }
 0xaf7   :  { %v926_v48 = vsub.f32 %v916_v41, %v924_v45  ;;  %v925_v50 = vmul.f32 0.03125, %v923_v46 }
 0xaf9   :  { %v927_v51 = vsub.f32 %v917_v42, %v925_v50  ;;  %v928_v52 = vmul.f32 %v926_v48, %v926_v48 }
 0xafb   :  { %v930_v53 = vsel %vm92_vm1, %v928_v52, 0.0  ;;  %v929_v54 = vmul.f32 %v927_v51, %v927_v51 }
 0xafc   :  { %931 = vadd.xlane.f32.xlu1 %v930_v53 }
 0xafd   :  { %v933_v11 = vsel %vm92_vm1, %v929_v54, 0.0 }
 0xafe   :  { %934 = vadd.xlane.f32.xlu0 %v933_v11 }
 0xb89   :  { %v932_v57 = vpop.xlane.xlu1 %931 }
 0xb8a   :  { %v936_v58 = vmul.f32 0.03125, %v932_v57 }
 0xb8b   :  { %v935_v59 = vpop.xlane.xlu0 %934 }
 0xb8c   :  { %v938_v60 = vadd.f32 1e-12, %v936_v58  ;;  %v937_v61 = vmul.f32 0.03125, %v935_v59 }
 0xb8e   :  { %2370 = vrsqrt.f32 %v938_v60  ;;  %v939_v62 = vadd.f32 1e-12, %v937_v61 }
 0xb90   :  { %2372 = vrsqrt.f32 %v939_v62 }
 0xb98   :  { %v2371_v5 = vpop.eup %2370 }
 0xb99   :  { %v942_v6 = vmul.f32 %v2371_v5, %v926_v48 }
 0xb9a   :  { %v2373_v7 = vpop.eup %2372 }
 0xb9b   :  { %v948_v8 = vmul.f32 %v947_v1, %v942_v6  ;;  %v943_v9 = vmul.f32 %v2373_v7, %v927_v51 }
 0xb9d   :  { %v949_v12 = vmul.f32 %v947_v1, %v943_v9  ;;  %v2757_v17 = vadd.f32 %v953_v10, %v948_v8 }
 0xb9f   :  { %v2759_v18 = vadd.f32 %v953_v10, %v949_v12 }
 0xba1   :  { %v958_v20 = vpack.c.bf16 %v2759_v18, %v2757_v17 }
 0xba3   :  { %2220 = vmatmul.mubr.msk.bf16.vlgmr.msra.gmra.mrb[24].mxu1 %vm92_vm1, %v958_v20 }
 0xba4   :  { %2225 = vmatprep.mubr.msk.bf16.mxu1 %vm2458_vm0, %v2457_v0 }
 0xc76   :  { %v1021_v22 = vpop.f32.mrb[24].mxu1 }
 0xc77   :  { %v1022_v23 = vadd.f32 %v2018_v21, %v1021_v22  ;;  %v2221_v16 = vpop.f32.mrb[25].mxu1 }
 0xc78   :  { %v1024_v25 = vpop.f32.mrb[26].mxu1 }
 0xc79   :  { %v2769_v26 = vpack.c.bf16 %v1022_v23, %v1022_v23  ;;  %v1025_v27 = vadd.f32 %v2018_v21, %v1024_v25  ;;  %v2222_v28 = vpop.f32.mrb[27].mxu1 }
 0xc7b   :  { %v2771_v29 = vpack.c.bf16 %v1025_v27, %v1025_v27  ;;  %1031 = vrot.lane.b32.xlu1 %v2769_v26, %s2459_s0 }
 0xc7d   :  { %1080 = vrot.lane.b32.xlu0 %v2771_v29, %s2459_s0 }
 0xced   :  { %v1032_v30 = vpop.permute.xlu1 %1031 }
 0xcee   :  { %v1037_v31 = vsel %vm142_vm2, %v1032_v30, 0 }
 0xcef   :  { %2224 = vmatpush3.bf16.xpose.msra.mxu1 %v1037_v31  ;;  %v1081_v32 = vpop.permute.xlu0 %1080 }
 0xcf0   :  { %v1086_v33 = vsel %vm142_vm2, %v1081_v32, 0  ;;  %2235 = vmatprep.subr.bf16.mxu1 %v2457_v0 }
 0xcf1   :  { %2230 = vmatpush3.bf16.xpose.msra.mxu0 %v1086_v33 }
 0xcf2   :  { %2241 = vmatprep.subr.bf16.mxu0 %v2457_v0 }
 0xcf6   :  { %2226 = vmatmul.mubr.msk.bf16.vlgmr.msra.gmra.mrb[28].mxu1 %vm142_vm2, %v2769_v26 }
 0xcf7   :  { %2237 = vmatprep.mubr.msk.bf16.mxu1 %vm2458_vm0, %v2457_v0 }
 0xcf8   :  { %2232 = vmatmul.mubr.msk.bf16.vlgmr.msra.gmra.mrb[28].mxu0 %vm142_vm2, %v2771_v29 }
 0xcf9   :  { %2243 = vmatprep.mubr.msk.bf16.mxu0 %vm2458_vm0, %v2457_v0 }
 0xdc9   :  { %v1073_v34 = vpop.f32.mrb[28].mxu1 }
 0xdca   :  { %v1074_v36 = vadd.f32 %v2590_v19, %v1073_v34  ;;  %v2227_v37 = vpop.f32.mrb[29].mxu1 }
 0xdcb   :  { %v1076_v38 = vpop.f32.mrb[30].mxu1  ;;  %v1122_v3 = vpop.f32.mrb[28].mxu0 }
 0xdcc   :  { %v1123_v39 = vadd.f32 %v2596_v24, %v1122_v3  ;;  %v2228_v4 = vpop.f32.mrb[31].mxu1  ;;  %v2233_v40 = vpop.f32.mrb[29].mxu0  ;;  %v1128_v41 = vsel %vm238_vm3, %v1074_v36, -inf }
 0xdcd   :  { %1129 = vmax.xlane.f32.xlu1 %v1128_v41  ;;  %v1125_v14 = vpop.f32.mrb[30].mxu0 }
 0xdce   :  { %v2234_v42 = vpop.f32.mrb[31].mxu0  ;;  %v1131_v43 = vsel %vm238_vm3, %v1123_v39, -inf }
 0xdcf   :  { %1132 = vmax.xlane.f32.xlu0 %v1131_v43 }
 0xdde   :  { %1158 = vrot.lane.b32.xlu1 %v2769_v26, %s2460_s20 }
 0xe5a   :  { %v1130_v44 = vpop.xlane.xlu1 %1129 }
 0xe5b   :  { %v1134_v45 = vsub.f32 %v1074_v36, %v1130_v44 }
 0xe5c   :  { %v1133_v46 = vpop.xlane.xlu0 %1132 }
 0xe5d   :  { %v1136_v48 = vmul.f32 1.442695, %v1134_v45  ;;  %v1135_v50 = vsub.f32 %v1123_v39, %v1133_v46 }
 0xe5e   :  { %v1159_v51 = vpop.permute.xlu1 %1158 }
 0xe5f   :  { %2374 = vpow2.f32 %v1136_v48  ;;  %v1138_v52 = vmul.f32 1.442695, %v1135_v50  ;;  %v1164_v53 = vsel %vm274_vm4, %v1159_v51, 0 }
 0xe60   :  { %2236 = vmatpush3.bf16.msra.mxu1 %v1164_v53 }
 0xe61   :  { %2376 = vpow2.f32 %v1138_v52  ;;  %2247 = vmatprep.subr.bf16.mxu1 %v2457_v0 }
 0xe69   :  { %v2375_v54 = vpop.eup %2374 }
 0xe6a   :  { %v1140_v11 = vsel %vm238_vm3, %v2375_v54, 0.0 }
 0xe6b   :  { %v2377_v55 = vpop.eup %2376  ;;  %1141 = vadd.xlane.f32.xlu1 %v1140_v11 }
 0xe6c   :  { %v1143_v56 = vsel %vm238_vm3, %v2377_v55, 0.0 }
 0xe6d   :  { %1144 = vadd.xlane.f32.xlu0 %v1143_v56 }
 0xe7c   :  { %1260 = vrot.lane.b32.xlu1 %v2769_v26, %s2461_s1 }
 0xe80   :  { %1310 = vrot.lane.b32.xlu1 %v2771_v29, %s2461_s1 }
 0xe83   :  { %1206 = vrot.lane.b32.xlu0 %v2771_v29, %s2460_s20 }
 0xe84   :  { %1308 = vrot.lane.b32.xlu1 %v2771_v29, %s2462_s21 }
 0xe87   :  { %1258 = vrot.lane.b32.xlu0 %v2769_v26, %s2462_s21 }
 0xef8   :  { %v1142_v57 = vpop.xlane.xlu1 %1141 }
 0xef9   :  { %2378 = vrcp.f32 %v1142_v57 }
 0xefa   :  { %v1145_v58 = vpop.xlane.xlu0 %1144 }
 0xefb   :  { %2380 = vrcp.f32 %v1145_v58 }
 0xefc   :  { %v1261_v7 = vpop.permute.xlu1 %1260 }
 0xefd   :  { %v1266_v16 = vsel %vm142_vm2, %v1261_v7, 0 }
 0xefe   :  { %v1207_v59 = vpop.permute.xlu0 %1206 }
 0xeff   :  { %v1212_v60 = vsel %vm274_vm4, %v1207_v59, 0 }
 0xf00   :  { %2242 = vmatpush3.bf16.msra.mxu0 %v1212_v60  ;;  %v1311_v22 = vpop.permute.xlu1 %1310 }
 0xf01   :  { %2253 = vmatprep.subr.bf16.mxu0 %v2457_v0  ;;  %v1316_v25 = vsel %vm142_vm2, %v1311_v22, 0  ;;  %v2338_v22 = vld [vmem:[%s2965_s5 + $0x10] sm:$0xff]  }
 0xf02   :  { %v1259_v27 = vpop.permute.xlu0 %1258 }
 0xf03   :  { %v2379_v61 = vpop.eup %2378 }
 0xf04   :  { %v1148_v62 = vmul.f32 %v2379_v61, %v1142_v57  ;;  %v1309_v28 = vpop.permute.xlu1 %1308 }
 0xf05   :  { %v2381_v1 = vpop.eup %2380 }
 0xf06   :  { %v1150_v5 = vsub.f32 2.0, %v1148_v62  ;;  %v1149_v6 = vmul.f32 %v2381_v1, %v1145_v58 }
 0xf08   :  { %v1152_v8 = vmul.f32 %v2379_v61, %v1150_v5  ;;  %v1151_v9 = vsub.f32 2.0, %v1149_v6 }
 0xf0a   :  { %v1154_v10 = vmul.f32 %v2375_v54, %v1152_v8  ;;  %v1153_v12 = vmul.f32 %v2381_v1, %v1151_v9 }
 0xf0c   :  { %v1156_v20 = vpack.c.bf16 %v1154_v10, %v1154_v10  ;;  %v1155_v21 = vmul.f32 %v2377_v55, %v1153_v12 }
 0xf0e   :  { %v1157_v23 = vpack.c.bf16 %v1155_v21, %v1155_v21  ;;  %2238 = vmatmul.mubr.msk.bf16.vlgmr.msra.gmra.mrb[32].mxu1 %vm238_vm3, %v1156_v20 }
 0xf0f   :  { %2248 = vmatpush3.bf16.xpose.msra.mxu1 %v1266_v16  ;;  %2249 = vmatprep.mubr.msk.bf16.mxu1 %vm2458_vm0, %v2457_v0  ;;  %v2339_v16 = vld [vmem:[%s2965_s5 + $0x18] sm:$0xff]  }
 0xf10   :  { %2244 = vmatmul.mubr.msk.bf16.vlgmr.msra.gmra.mrb[32].mxu0 %vm238_vm3, %v1157_v23  ;;  %2259 = vmatprep.subr.bf16.mxu1 %v2457_v0 }
 0xf11   :  { %2254 = vmatpush3.bf16.xpose.msra.mxu0 %v1316_v25  ;;  %2255 = vmatprep.mubr.msk.bf16.mxu0 %vm2458_vm0, %v2457_v0 }
 0xf12   :  { %2265 = vmatprep.subr.bf16.mxu0 %v2457_v0 }
 0xf16   :  { %2250 = vmatmul.mubr.msk.bf16.vlgmr.msra.gmra.mrb[36].mxu1 %vm142_vm2, %v1259_v27 }
 0xf17   :  { %2261 = vmatprep.mubr.msk.bf16.mxu1 %vm2458_vm0, %v2457_v0 }
 0xf18   :  { %2256 = vmatmul.mubr.msk.bf16.vlgmr.msra.gmra.mrb[36].mxu0 %vm142_vm2, %v1309_v28 }
 0xf19   :  { %2267 = vmatprep.mubr.msk.bf16.mxu0 %vm2458_vm0, %v2457_v0 }
 0xfe1   :  { %v2827_v30 = vpop.f32.mrb[32].mxu1 }
 0xfe2   :  { %v2239_v31 = vpop.f32.mrb[33].mxu1 }
 0xfe3   :  { %v1203_v32 = vpop.f32.mrb[34].mxu1  ;;  %v2829_v33 = vpop.f32.mrb[32].mxu0 }
 0xfe4   :  { %v1254_v34 = vpack.c.bf16 %v2829_v33, %v2827_v30  ;;  %v2240_v36 = vpop.f32.mrb[35].mxu1  ;;  %v2245_v37 = vpop.f32.mrb[33].mxu0 }
 0xfe5   :  { %v1251_v38 = vpop.f32.mrb[34].mxu0 }
 0xfe6   :  { %v2246_v3 = vpop.f32.mrb[35].mxu0 }
 0xfe9   :  { %v1302_v39 = vpop.f32.mrb[36].mxu1 }
 0xfea   :  { %v1303_v4 = vadd.f32 %v2590_v19, %v1302_v39  ;;  %v2251_v40 = vpop.f32.mrb[37].mxu1 }
 0xfeb   :  { %v1305_v41 = vpop.f32.mrb[38].mxu1  ;;  %v1352_v14 = vpop.f32.mrb[36].mxu0 }
 0xfec   :  { %v1353_v42 = vadd.f32 %v2596_v24, %v1352_v14  ;;  %v2252_v43 = vpop.f32.mrb[39].mxu1  ;;  %v2257_v44 = vpop.f32.mrb[37].mxu0  ;;  %v1358_v45 = vsel %vm238_vm3, %v1303_v4, -inf }
 0xfed   :  { %1359 = vmax.xlane.f32.xlu0 %v1358_v45  ;;  %v1355_v46 = vpop.f32.mrb[38].mxu0 }
 0xfee   :  { %v2258_v48 = vpop.f32.mrb[39].mxu0  ;;  %v1361_v50 = vsel %vm238_vm3, %v1353_v42, -inf }
 0xfef   :  { %1362 = vmax.xlane.f32.xlu1 %v1361_v50 }
0x1000   :  { %1388 = vrot.lane.b32.xlu1 %v2769_v26, %s2463_s22 }
0x107a   :  { %v1360_v51 = vpop.xlane.xlu0 %1359 }
0x107b   :  { %v1364_v19 = vsub.f32 %v1303_v4, %v1360_v51  ;;  %v2873_v4 = vld [vmem:[%s2969_s9 + $0x8] sm:$0x3f] }
0x107c   :  { %v1363_v52 = vpop.xlane.xlu1 %1362 }
0x107d   :  { %v1366_v53 = vmul.f32 1.442695, %v1364_v19  ;;  %v1365_v54 = vsub.f32 %v1353_v42, %v1363_v52  ;;  %v1593_v42 = vrot.slane %v2873_v4, %v703_v15 }
0x107f   :  { %2382 = vpow2.f32 %v1366_v53  ;;  %v1368_v24 = vmul.f32 1.442695, %v1365_v54 }
0x1080   :  { %v1389_v11 = vpop.permute.xlu1 %1388 }
0x1081   :  { %2384 = vpow2.f32 %v1368_v24  ;;  %v1394_v55 = vsel %vm274_vm4, %v1389_v11, 0 }
0x1082   :  { %2260 = vmatpush3.bf16.msra.mxu1 %v1394_v55 }
0x1083   :  { %2271 = vmatprep.subr.bf16.mxu1 %v2457_v0 }
0x1089   :  { %v2383_v56 = vpop.eup %2382 }
0x108a   :  { %v1370_v57 = vsel %vm238_vm3, %v2383_v56, 0.0 }
0x108b   :  { %v2385_v58 = vpop.eup %2384  ;;  %1371 = vadd.xlane.f32.xlu0 %v1370_v57 }
0x108c   :  { %v1373_v26 = vsel %vm238_vm3, %v2385_v58, 0.0 }
0x108f   :  { %1374 = vadd.xlane.f32.xlu0 %v1373_v26  ;;  %v2341_v26 = vld [vmem:[%s2966_s6 + $0x18] sm:$0xff]  }
0x10a5   :  { %1436 = vrot.lane.b32.xlu0 %v2771_v29, %s2463_s22 }
0x1118   :  { %v1372_v59 = vpop.xlane.xlu0 %1371 }
0x1119   :  { %2386 = vrcp.f32 %v1372_v59 }
0x111c   :  { %v1375_v60 = vpop.xlane.xlu0 %1374 }
0x111d   :  { %2388 = vrcp.f32 %v1375_v60 }
0x1120   :  { %v1437_v61 = vpop.permute.xlu0 %1436 }
0x1121   :  { %v1442_v62 = vsel %vm274_vm4, %v1437_v61, 0 }
0x1122   :  { %2266 = vmatpush3.bf16.msra.mxu0 %v1442_v62 }
0x1123   :  { %v2387_v1 = vpop.eup %2386  ;;  %2277 = vmatprep.subr.bf16.mxu0 %v2457_v0 }
0x1124   :  { %v1378_v5 = vmul.f32 %v2387_v1, %v1372_v59 }
0x1126   :  { %v1380_v6 = vsub.f32 2.0, %v1378_v5 }
0x1127   :  { %v2389_v7 = vpop.eup %2388 }
0x1128   :  { %v1382_v8 = vmul.f32 %v2387_v1, %v1380_v6  ;;  %v1379_v9 = vmul.f32 %v2389_v7, %v1375_v60  ;;  %v1625_v6 = vrot.slane %v2873_v4, %v736_v47  ;;  %v2342_v47 = vld [vmem:[%s2968_s8 + $0x20] sm:$0xff]  }
0x112a   :  { %v1384_v10 = vmul.f32 %v2383_v56, %v1382_v8  ;;  %v1381_v12 = vsub.f32 2.0, %v1379_v9 }
0x112c   :  { %v1386_v20 = vpack.c.bf16 %v1384_v10, %v1384_v10  ;;  %v1383_v29 = vmul.f32 %v2389_v7, %v1381_v12 }
0x112e   :  { %v1385_v21 = vmul.f32 %v2385_v58, %v1383_v29  ;;  %2262 = vmatmul.mubr.msk.bf16.vlgmr.msra.gmra.mrb[40].mxu1 %vm238_vm3, %v1386_v20  ;;  %v2340_v58 = vld [vmem:[%s2966_s6 + $0x10] sm:$0xff]   ;;  %v1631_v20 = vrot.slane %v2873_v4, %v742_v49  ;;  %v2343_v49 = vld [vmem:[%s2968_s8 + $0x28] sm:$0xff]  }
0x112f   :  { %2273 = vmatprep.mubr.msk.bf16.mxu1 %vm2458_vm0, %v2457_v0  ;;  %2272 = vmatpush3.bf16.msra.mxu1 %v2339_v16  ;;  %v2344_v16 = vld [vmem:[%s2968_s8 + $0x30] sm:$0xff]  }
0x1130   :  { %v1387_v23 = vpack.c.bf16 %v1385_v21, %v1385_v21  ;;  %2283 = vmatprep.subr.bf16.mxu1 %v2457_v0 }
0x1132   :  { %2268 = vmatmul.mubr.msk.bf16.vlgmr.msra.gmra.mrb[40].mxu0 %vm238_vm3, %v1387_v23 }
0x1133   :  { %2278 = vmatpush3.bf16.msra.mxu0 %v2338_v22  ;;  %2279 = vmatprep.mubr.msk.bf16.mxu0 %vm2458_vm0, %v2457_v0 }
0x1134   :  { %2291 = vmatprep.subr.bf16.mxu0 %v2457_v0 }
0x113a   :  { %2280 = vmatmul.mubr.msk.bf16.vlgmr.msra.gmra.mrb[44].mxu0 %vm142_vm2, %v1254_v34 }
0x113b   :  { %2299 = vmatprep.mubr.msk.bf16.mxu0 %vm2458_vm0, %v2457_v0  ;;  %2292 = vmatpush3.bf16.msra.mxu0 %v2342_v47 }
0x113c   :  { %2293 = vmatprep.subr.bf16.mxu0 %v2457_v0 }
0x113f   :  { %2294 = vmatpush3.bf16.msra.mxu0 %v2343_v49 }
0x1140   :  { %2295 = vmatprep.subr.bf16.mxu0 %v2457_v0 }
0x1143   :  { %2296 = vmatpush3.bf16.msra.mxu0 %v2344_v16 }
0x1144   :  { %2297 = vmatprep.subr.bf16.mxu0 %v2457_v0 }
0x1201   :  { %v1430_v25 = vpop.f32.mrb[40].mxu1 }
0x1202   :  { %v2263_v27 = vpop.f32.mrb[41].mxu1 }
0x1203   :  { %v1433_v28 = vpop.f32.mrb[42].mxu1  ;;  %v2042_v27 = vld [vmem:[#allocation2 + $0x1] ss:$0 sm:$0xff] }
0x1204   :  { %v2264_v31 = vpop.f32.mrb[43].mxu1 }
0x1205   :  { %v1478_v32 = vpop.f32.mrb[40].mxu0 }
0x1206   :  { %v1484_v36 = vpack.c.bf16 %v1478_v32, %v1430_v25  ;;  %v2269_v37 = vpop.f32.mrb[41].mxu0  ;;  %v2345_v25 = vld [vmem:[%s2968_s8 + $0x38] sm:$0xff]  }
0x1207   :  { %v1481_v30 = vpop.f32.mrb[42].mxu0  ;;  %2298 = vmatpush3.bf16.msra.mxu0 %v2345_v25 }
0x1208   :  { %v2270_v33 = vpop.f32.mrb[43].mxu0  ;;  %2274 = vmatmul.mubr.msk.bf16.vlgmr.msra.gmra.mrb[44].mxu1 %vm142_vm2, %v1484_v36 }
0x1209   :  { %2287 = vmatprep.mubr.msk.bf16.mxu1 %vm2458_vm0, %v2457_v0  ;;  %2284 = vmatpush3.bf16.msra.mxu1 %v2340_v58 }
0x120a   :  { %2285 = vmatprep.subr.bf16.mxu1 %v2457_v0 }
0x120d   :  { %v1581_v34 = vpop.f32.mrb[44].mxu0  ;;  %2286 = vmatpush3.bf16.msra.mxu1 %v2341_v26 }
0x120e   :  { %v2281_v38 = vpop.f32.mrb[45].mxu0  ;;  %2303 = vmatprep.subr.bf16.mxu1 %v2457_v0 }
0x120f   :  { %v1584_v3 = vpop.f32.mrb[46].mxu0 }
0x1210   :  { %v2282_v39 = vpop.f32.mrb[47].mxu0 }
0x12db   :  { %v1531_v40 = vpop.f32.mrb[44].mxu1 }
0x12dc   :  { %v1582_v41 = vadd.f32 %v1581_v34, %v1531_v40  ;;  %v2275_v14 = vpop.f32.mrb[45].mxu1 }
0x12dd   :  { %v1534_v43 = vpop.f32.mrb[46].mxu1 }
0x12de   :  { %v1588_v44 = vadd.f32 %v1582_v41, %v2757_v17  ;;  %v1585_v45 = vadd.f32 %v1584_v3, %v1534_v43  ;;  %v2276_v46 = vpop.f32.mrb[47].mxu1 }
0x12e0   :  { %v1589_v48 = vadd.f32 %v1585_v45, %v2759_v18  ;;  %v1594_v50 = vadd.f32 %v1593_v42, %v1588_v44 }
0x12e2   :  { %v1596_v51 = vsel %vm92_vm1, %v1594_v50, 0.0  ;;  %v1595_v19 = vadd.f32 %v1593_v42, %v1589_v48 }
0x12e3   :  { %1597 = vadd.xlane.f32.xlu1 %v1596_v51 }
0x12e4   :  { %v1599_v52 = vsel %vm92_vm1, %v1595_v19, 0.0 }
0x12e5   :  { %1600 = vadd.xlane.f32.xlu0 %v1599_v52 }
0x1370   :  { %v1598_v53 = vpop.xlane.xlu1 %1597 }
0x1371   :  { %v1602_v54 = vmul.f32 0.03125, %v1598_v53 }
0x1372   :  { %v1601_v24 = vpop.xlane.xlu0 %1600 }
0x1373   :  { %v1604_v11 = vsub.f32 %v1594_v50, %v1602_v54  ;;  %v1603_v15 = vmul.f32 0.03125, %v1601_v24  ;;  %v1805_v54 = vrot.slane %v2873_v4, %v914_v35 }
0x1375   :  { %v1605_v55 = vsub.f32 %v1595_v19, %v1603_v15  ;;  %v1606_v56 = vmul.f32 %v1604_v11, %v1604_v11 }
0x1377   :  { %v1608_v17 = vsel %vm92_vm1, %v1606_v56, 0.0  ;;  %v1607_v57 = vmul.f32 %v1605_v55, %v1605_v55 }
0x1378   :  { %1609 = vadd.xlane.f32.xlu1 %v1608_v17 }
0x1379   :  { %v1611_v18 = vsel %vm92_vm1, %v1607_v57, 0.0 }
0x137a   :  { %1612 = vadd.xlane.f32.xlu0 %v1611_v18 }
0x1405   :  { %v1610_v59 = vpop.xlane.xlu1 %1609 }
0x1406   :  { %v1614_v60 = vmul.f32 0.03125, %v1610_v59 }
0x1407   :  { %v1613_v61 = vpop.xlane.xlu0 %1612 }
0x1408   :  { %v1616_v62 = vadd.f32 1e-12, %v1614_v60  ;;  %v1615_v1 = vmul.f32 0.03125, %v1613_v61 }
0x140a   :  { %2390 = vrsqrt.f32 %v1616_v62  ;;  %v1617_v5 = vadd.f32 1e-12, %v1615_v1 }
0x140c   :  { %2392 = vrsqrt.f32 %v1617_v5 }
0x1414   :  { %v2391_v7 = vpop.eup %2390 }
0x1415   :  { %v1620_v8 = vmul.f32 %v2391_v7, %v1604_v11 }
0x1416   :  { %v2393_v9 = vpop.eup %2392 }
0x1417   :  { %v1626_v10 = vmul.f32 %v1625_v6, %v1620_v8  ;;  %v1621_v12 = vmul.f32 %v2393_v9, %v1605_v55  ;;  %v1848_v9 = vld [vmem:[%s2962_s2] sm:$0x1] }
0x1419   :  { %v1627_v29 = vmul.f32 %v1625_v6, %v1621_v12  ;;  %v1632_v21 = vadd.f32 %v1631_v20, %v1626_v10  ;;  %v1849_v10 = vld [vmem:[%s2962_s2 + $0x1] sm:$0x1]  ;;  %v1942_v12 = vunpack.c.l.bf16 %v1848_v9  ;;  %s2464_s2 = smov [#allocation5]  }
0x141a   :  { %s1971_s28 = sshll.u32 %s2464_s2, 4  ;;  %s1972_s28 = int_to_ptr.vmem [resolvable:$true] %s1971_s28 }
0x141b   :  { %v1633_v22 = vadd.f32 %v1631_v20, %v1627_v29  ;;  %v1943_v20 = vunpack.c.l.bf16 %v1849_v10  ;;  %v1945_v29 = vsel %vm1944_vm6, %v1942_v12, 0.0  ;;  %s2428_s7 = scalar_lea.vmem %s1972_s28, 32  ;;  %p2433_p9 = scmp.lt.s32.totalorder %s1972_s28, %s1972_s28 }
0x141c   :  { %p2429_p8 = scmp.ne.s32.totalorder %s1972_s28, %s2428_s7  ;;  %p2434_p10 = scmp.lt.s32.totalorder %s2428_s7, %s2428_s7 }
0x141d   :  { %v1634_v23 = vpack.c.bf16 %v1633_v22, %v1632_v21 }
0x141e   :  { %p2435_p11 = por %p2434_p10, %p2433_p9 }
0x141f   :  { %2288 = vmatmul.mubr.msk.bf16.vlgmr.msra.gmra.mrb[48].mxu1 %vm92_vm1, %v1634_v23 }
0x1420   :  { %2305 = vmatprep.mubr.msk.bf16.mxu1 %vm2458_vm0, %v2457_v0  ;;  %p2436_p12 = pnand %p2435_p11, %p2429_p8 }
0x14f2   :  { %v1697_v28 = vpop.f32.mrb[48].mxu1 }
0x14f3   :  { %v1698_v31 = vadd.f32 %v2042_v27, %v1697_v28  ;;  %v2289_v32 = vpop.f32.mrb[49].mxu1 }
0x14f4   :  { %v1700_v36 = vpop.f32.mrb[50].mxu1  ;;  %v1843_v32 = vrot.slane %v2873_v4, %v952_v2 }
0x14f5   :  { %v1704_v37 = vmul.f32 %v1698_v31, %v1698_v31  ;;  %v1701_v30 = vadd.f32 %v2042_v27, %v1700_v36  ;;  %v2290_v33 = vpop.f32.mrb[51].mxu1  ;;  %v1837_v27 = vrot.slane %v2873_v4, %v946_v63 }
0x14f7   :  { %v1706_v34 = vmul.f32 %v1704_v37, %v1698_v31  ;;  %v1705_v38 = vmul.f32 %v1701_v30, %v1701_v30 }
0x14f9   :  { %v1708_v3 = vmul.f32 0.044715, %v1706_v34  ;;  %v1707_v39 = vmul.f32 %v1705_v38, %v1701_v30 }
0x14fb   :  { %v1710_v40 = vadd.f32 %v1708_v3, %v1698_v31  ;;  %v1709_v41 = vmul.f32 0.044715, %v1707_v39 }
0x14fd   :  { %v1712_v14 = vmul.f32 0.7978846, %v1710_v40  ;;  %v1711_v42 = vadd.f32 %v1709_v41, %v1701_v30 }
0x14ff   :  { %2394 = vtanh.f32 %v1712_v14  ;;  %v1713_v43 = vmul.f32 0.7978846, %v1711_v42 }
0x1501   :  { %2396 = vtanh.f32 %v1713_v43 }
0x1509   :  { %v2395_v44 = vpop.eup %2394 }
0x150a   :  { %v1716_v45 = vadd.f32 1.0, %v2395_v44 }
0x150b   :  { %v2397_v46 = vpop.eup %2396 }
0x150c   :  { %v1718_v48 = vmul.f32 0.5, %v1716_v45  ;;  %v1717_v50 = vadd.f32 1.0, %v2397_v46 }
0x150e   :  { %v1719_v51 = vmul.f32 0.5, %v1717_v50  ;;  %v1720_v19 = vmul.f32 %v1718_v48, %v1698_v31 }
0x1510   :  { %v1721_v52 = vmul.f32 %v1719_v51, %v1701_v30 }
0x1512   :  { %v1722_v53 = vpack.c.bf16 %v1721_v52, %v1720_v19 }
0x1514   :  { %2300 = vmatmul.mubr.msk.bf16.vlgmr.msra.gmra.mrb[48].mxu0 %vm865_vm5, %v1722_v53 }
0x15e7   :  { %v1793_v24 = vpop.f32.mrb[48].mxu0 }
0x15e8   :  { %v1800_v11 = vadd.f32 %v1793_v24, %v1632_v21  ;;  %v2301_v15 = vpop.f32.mrb[49].mxu0  ;;  %v1948_v21 = vsel %vm1944_vm6, %v1943_v20, 0.0 }
0x15e9   :  { %v1796_v55 = vpop.f32.mrb[50].mxu0 }
0x15ea   :  { %v1801_v56 = vadd.f32 %v1796_v55, %v1633_v22  ;;  %v2302_v17 = vpop.f32.mrb[51].mxu0  ;;  %v1806_v57 = vadd.f32 %v1805_v54, %v1800_v11 }
0x15ec   :  { %v1808_v18 = vsel %vm92_vm1, %v1806_v57, 0.0  ;;  %v1807_v58 = vadd.f32 %v1805_v54, %v1801_v56 }
0x15ed   :  { %1809 = vadd.xlane.f32.xlu1 %v1808_v18 }
0x15ee   :  { %v1811_v26 = vsel %vm92_vm1, %v1807_v58, 0.0 }
0x15ef   :  { %1812 = vadd.xlane.f32.xlu0 %v1811_v26 }
0x167a   :  { %v1810_v59 = vpop.xlane.xlu1 %1809 }
0x167b   :  { %v1814_v60 = vmul.f32 0.03125, %v1810_v59 }
0x167c   :  { %v1813_v61 = vpop.xlane.xlu0 %1812 }
0x167d   :  { %v1816_v62 = vsub.f32 %v1806_v57, %v1814_v60  ;;  %v1815_v1 = vmul.f32 0.03125, %v1813_v61 }
0x167f   :  { %v1817_v35 = vsub.f32 %v1807_v58, %v1815_v1  ;;  %v1818_v5 = vmul.f32 %v1816_v62, %v1816_v62 }
0x1681   :  { %v1820_v6 = vsel %vm92_vm1, %v1818_v5, 0.0  ;;  %v1819_v7 = vmul.f32 %v1817_v35, %v1817_v35 }
0x1682   :  { %1821 = vadd.xlane.f32.xlu1 %v1820_v6 }
0x1683   :  { %v1823_v8 = vsel %vm92_vm1, %v1819_v7, 0.0 }
0x1684   :  { %1824 = vadd.xlane.f32.xlu0 %v1823_v8 }
0x1686   :  { %1946 = vadd.xlane.f32.xlu1 %v1945_v29 }
0x1688   :  { %1949 = vadd.xlane.f32.xlu0 %v1948_v21 }
0x170f   :  { %v1822_v22 = vpop.xlane.xlu1 %1821 }
0x1710   :  { %v1826_v23 = vmul.f32 0.03125, %v1822_v22 }
0x1711   :  { %v1825_v47 = vpop.xlane.xlu0 %1824 }
0x1712   :  { %v1828_v49 = vadd.f32 1e-12, %v1826_v23  ;;  %v1827_v16 = vmul.f32 0.03125, %v1825_v47 }
0x1713   :  { %v1947_v13 = vpop.xlane.xlu1 %1946 }
0x1714   :  { %2398 = vrsqrt.f32 %v1828_v49  ;;  %v1829_v25 = vadd.f32 1e-12, %v1827_v16  ;;  %v1951_v2 = vmax.f32 %v1947_v13, 1e-09 }
0x1715   :  { %v1950_v4 = vpop.xlane.xlu0 %1949 }
0x1716   :  { %2400 = vrsqrt.f32 %v1829_v25  ;;  %v1952_v41 = vmax.f32 %v1950_v4, 1e-09 }
0x1717   :  { %2402 = vrcp.f32 %v1951_v2 }
0x1718   :  { %2404 = vrcp.f32 %v1952_v41 }
0x171e   :  { %v2399_v28 = vpop.eup %2398 }
0x171f   :  { %v1832_v31 = vmul.f32 %v2399_v28, %v1816_v62 }
0x1720   :  { %v2401_v36 = vpop.eup %2400 }
0x1721   :  { %v1838_v37 = vmul.f32 %v1837_v27, %v1832_v31  ;;  %v1833_v30 = vmul.f32 %v2401_v36, %v1817_v35  ;;  %v2403_v14 = vpop.eup %2402 }
0x1722   :  { %v1955_v42 = vmul.f32 %v2403_v14, %v1951_v2  ;;  %v2405_v44 = vpop.eup %2404 }
0x1723   :  { %v1844_v33 = vadd.f32 %v1843_v32, %v1838_v37  ;;  %v1839_v34 = vmul.f32 %v1837_v27, %v1833_v30  ;;  %v1956_v45 = vmul.f32 %v2405_v44, %v1952_v41 }
0x1724   :  { %v1957_v43 = vsub.f32 2.0, %v1955_v42 }
0x1725   :  { %v1846_v38 = vpack.c.bf16 %v1844_v33, %v1844_v33  ;;  %v1845_v3 = vadd.f32 %v1843_v32, %v1839_v34 }
0x1726   :  { %v1959_v46 = vmul.f32 %v2403_v14, %v1957_v43 }
0x1727   :  { %v1854_v39 = vsel %vm274_vm4, %v1846_v38, 0  ;;  %v1847_v40 = vpack.c.bf16 %v1845_v3, %v1845_v3 }
0x1728   :  { %2304 = vmatpush3.bf16.msra.mxu1 %v1854_v39 }
0x1729   :  { %2309 = vmatprep.subr.bf16.mxu1 %v2457_v0  ;;  %v1900_v63 = vsel %vm274_vm4, %v1847_v40, 0 }
0x172b   :  { %2306 = vmatmul.mubr.msk.bf16.vlgmr.msra.gmra.mrb[52].mxu1 %vm238_vm3, %v1848_v9 }
0x172c   :  { %2310 = vmatpush3.bf16.msra.mxu1 %v1900_v63  ;;  %2311 = vmatprep.mubr.msk.bf16.mxu1 %vm2458_vm0, %v2457_v0  ;;  %v1958_v0 = vsub.f32 2.0, %v1956_v45 }
0x172e   :  { %v1960_v53 = vmul.f32 %v2405_v44, %v1958_v0 }
0x1733   :  { %2312 = vmatmul.mubr.msk.bf16.vlgmr.msra.gmra.mrb[56].mxu1 %vm238_vm3, %v1849_v10 }
0x17fe   :  { %v1890_v48 = vpop.f32.mrb[52].mxu1 }
0x17ff   :  { %v1961_v50 = vmul.f32 %v1959_v46, %v1890_v48  ;;  %v2307_v51 = vpop.f32.mrb[53].mxu1 }
0x1800   :  { %v1893_v19 = vpop.f32.mrb[54].mxu1 }
0x1801   :  { %v2308_v52 = vpop.f32.mrb[55].mxu1  ;;  %1964 = vst.msk [vmem:[#allocation5] sm:$0x1] %vm1963_vm7, %v1961_v50 }
0x1806   :  { %v1936_v54 = vpop.f32.mrb[56].mxu1 }
0x1807   :  { %v1962_v24 = vmul.f32 %v1960_v53, %v1936_v54  ;;  %v2313_v11 = vpop.f32.mrb[57].mxu1 }
0x1808   :  { %v1939_v15 = vpop.f32.mrb[58].mxu1 }
0x1809   :  { %v2314_v55 = vpop.f32.mrb[59].mxu1  ;;  %1965 = vst.msk [vmem:[#allocation5 + $0x1] sm:$0x1] %vm1963_vm7, %v1962_v24 }
0x180a   :  { %2439 = shalt.err (!%p2436_p12)
}
0x180b   :  { %s2440_s30 = scalar_lea.hbm %s2970_s10, 32 }
0x180c   :  { %p2441_p13 = scmp.ne.s32.totalorder %s2970_s10, %s2440_s30  ;;  %p2444_p0 = scmp.lt.u32.totalorder %s2440_s30, %s2970_s10 }
0x180e   :  { %p2446_p1 = pnand %p2444_p0, %p2441_p13 }
0x1810   :  { %2449 = shalt.err (!%p2446_p1)
}
0x1811   :  { %1977 = dma.vmem_to_hbm [thread:$0]  %s1972_s28, 32, %s2970_s10, [#allocation4], %s2455_s23, %s2455_s23, %s2456_s24  }
0x1812   :  { %2452 = dma.done.wait [#allocation4], 32  }
0x1813   :  { %2453 = vsyncadd [#allocation4], 4294967264 }
0x1814   :  { %1981 = vsyncpa [#allocation3], 1 }
0x1815   :  { %1982 = vsyncpa [#allocation4], 1 }

</bundles_post_ra>
